<compile_context>
chip_gen: v6e
topology: v6e:2x2x1
jax: 0.10.0
libtpu: 0.0.40
codegen_flags: <defaults>
</compile_context>

<pallas_src>
import functools
import math

import jax
import jax.numpy as jnp
from jax.experimental import pallas as pl
from jax.experimental.pallas import tpu as pltpu


def _round_up(x, m):
    return ((x + m - 1) // m) * m


def _choose_batch_tile(B):
    # Small batch: one block covering the whole batch (block dim == array dim is
    # always a legal sublane size, even when B is not a multiple of 8).
    if B <= 512:
        return B
    # Medium batch: two tiles so v7x's second TensorCore has work (grid length 2).
    if B <= 2048:
        return _round_up(pl.cdiv(B, 2), 16)
    # Large batch: ~512-1024 row tiles, even grid length (megacore / 2 TCs).
    n_tiles = 2 * pl.cdiv(B, 2048)
    return _round_up(pl.cdiv(B, n_tiles), 16)


def _vmem_capacity_bytes():
    try:
        return int(pltpu.get_tpu_info().vmem_capacity_bytes)
    except Exception:
        return 64 << 20          # conservative default (v7x has the smallest VMEM)


def mlp_kernel(x_ref, w1_ref, b1_ref, w2_ref, b2_ref,
               w3_ref, b3_ref, w4_ref, b4_ref, o_ref):
    # x tile arrives as f32; cast to bf16 on the VPU (hidden under the MXU) so the
    # wrapper never does a separate HBM pass just to change dtype.
    x = x_ref[...].astype(jnp.bfloat16)
    h = jnp.dot(x, w1_ref[...], preferred_element_type=jnp.float32) + b1_ref[...]
    h = jnp.maximum(h, 0.0)                   # ReLU (Dropout = identity, eval mode)
    h = jnp.dot(h.astype(jnp.bfloat16), w2_ref[...],
                preferred_element_type=jnp.float32) + b2_ref[...]
    h = jnp.maximum(h, 0.0)
    h = jnp.dot(h.astype(jnp.bfloat16), w3_ref[...],
                preferred_element_type=jnp.float32) + b3_ref[...]
    h = jnp.maximum(h, 0.0)
    o_ref[...] = (jnp.dot(h.astype(jnp.bfloat16), w4_ref[...],
                          preferred_element_type=jnp.float32)
                  + b4_ref[...]).astype(o_ref.dtype)


@functools.partial(jax.jit, static_argnames=("tb",))
def mlp_forward(x_nchw, params, *, tb=None):
    w1, b1, w2, b2, w3, b3, w4, b4 = params
    B = x_nchw.shape[0]
    latent = w1.shape[0]
    n_out = w4.shape[1]

    # nn.Flatten: (B, C, H, W) -> (B, C*H*W), row-major (matches PyTorch).
    x = x_nchw.reshape(B, -1)
    assert x.shape[1] == latent

    if tb is None:
        tb = _choose_batch_tile(B)
    grid = (pl.cdiv(B, tb),)      # partial last block is masked by Pallas; no jnp.pad

    # Lane-dense output: pad the final layer 10 -> 128 lanes so the store is an
    # unmasked vst; the wrapper slices [:, :n_out] afterwards.
    n_out_p = _round_up(max(n_out, 128), 128)
    w4p = jnp.pad(w4, ((0, 0), (0, n_out_p - n_out)))
    b4p = jnp.pad(b4, ((0, 0), (0, n_out_p - n_out)))

    # Weights in bf16 for the MXU (accumulation + bias/ReLU stay f32 in-kernel).
    w1c, w2c, w3c, w4c = (w.astype(jnp.bfloat16) for w in (w1, w2, w3, w4p))
    b1c, b2c, b3c, b4c = (b.astype(jnp.float32) for b in (b1, b2, b3, b4p))

    weight_elems = latent * 512 + 512 * 256 + 256 * 128 + 128 * n_out_p
    # Constant index_maps mean weights are fetched once and stay resident; once the
    # footprint is big enough to matter (large latent, v7x's 64 MiB VMEM), request a
    # single pipeline buffer instead of the default two.
    single_buffer_weights = weight_elems * 2 > (8 << 20)

    def resident(shape):
        idx_map = lambda i: (0,) * len(shape)
        if single_buffer_weights:
            return pl.BlockSpec(shape, idx_map, pipeline_mode=pl.Buffered(1))
        return pl.BlockSpec(shape, idx_map)

    weight_bufs = 1 if single_buffer_weights else 2
    vmem_needed = (2 * tb * latent * 4            # x tile, f32, double-buffered
                   + 2 * tb * n_out_p * 4         # out tile, f32, double-buffered
                   + weight_bufs * weight_elems * 2   # resident bf16 weights
                   + 6 * tb * 512 * 4             # f32/bf16 intermediates + slack
                   + (8 << 20))                   # misc headroom
    vmem_cap = _vmem_capacity_bytes() - (16 << 20)    # compiler scratch / spill slack
    vmem_limit = int(max(32 << 20, min(vmem_needed, vmem_cap)))

    flops = 2 * B * (latent * 512 + 512 * 256 + 256 * 128 + 128 * n_out_p)
    bytes_accessed = (B * latent * 4 + weight_elems * 2
                      + (512 + 256 + 128 + n_out_p) * 4 + B * n_out_p * 4)

    # TODO(synk): emit bf16 output here (halves writeback) if downstream tolerates it.
    out_padded = pl.pallas_call(
        mlp_kernel,
        out_shape=jax.ShapeDtypeStruct((B, n_out_p), jnp.float32),
        grid_spec=pltpu.PrefetchScalarGridSpec(
            num_scalar_prefetch=0,
            grid=grid,
            in_specs=[
                pl.BlockSpec((tb, latent), lambda i: (i, 0)),   # x batch tile (f32)
                resident(w1c.shape), resident(b1c.shape),
                resident(w2c.shape), resident(b2c.shape),
                resident(w3c.shape), resident(b3c.shape),
                resident(w4c.shape), resident(b4c.shape),
            ],
            out_specs=pl.BlockSpec((tb, n_out_p), lambda i: (i, 0)),
        ),
        compiler_params=pltpu.CompilerParams(
            dimension_semantics=("parallel",),
            vmem_limit_bytes=vmem_limit),
        cost_estimate=pl.CostEstimate(flops=int(flops), transcendentals=0,
                                      bytes_accessed=int(bytes_accessed)),
    )(x, w1c, b1c, w2c, b2c, w3c, b3c, w4c, b4c)

    # Drop the lane padding of the final layer.
    return out_padded[:, :n_out]


def init_params(key, latent_size):
    """Deterministic init mimicking nn.Linear default (uniform +/- 1/sqrt(fan_in)).

    Weights stored as (in_features, out_features) so the kernel computes x @ W + b."""
    dims = [(latent_size, 512), (512, 256), (256, 128), (128, 10)]
    params = []
    for (fan_in, fan_out) in dims:
        key, kw, kb = jax.random.split(key, 3)
        bound = 1.0 / math.sqrt(fan_in)
        w = jax.random.uniform(kw, (fan_in, fan_out), jnp.float32, -bound, bound)
        b = jax.random.uniform(kb, (1, fan_out), jnp.float32, -bound, bound)
        params += [w, b]
    return tuple(params)


def reference_forward(x_nchw, params):
    # Plain-JAX reference of the same math (bf16 matmul operands, f32 accumulation).
    w1, b1, w2, b2, w3, b3, w4, b4 = params
    bf = jnp.bfloat16

    def lin(h, w, b):
        return jnp.dot(h.astype(bf), w.astype(bf),
                       preferred_element_type=jnp.float32) + b

    h = x_nchw.reshape(x_nchw.shape[0], -1)
    h = jnp.maximum(lin(h, w1, b1), 0.0)
    h = jnp.maximum(lin(h, w2, b2), 0.0)
    h = jnp.maximum(lin(h, w3, b3), 0.0)
    return lin(h, w4, b4)


if __name__ == "__main__":
    # small NCHW input: (B, C=4, H=16, W=16) -> latent = 4*16*16 = 1024
    C, H, W = 4, 16, 16
    latent_size = C * H * W
    params = init_params(jax.random.PRNGKey(0), latent_size)

    key = jax.random.PRNGKey(0)
    # B=8: single small tile; B=5: block dim == array dim (non-multiple-of-8);
    # B=532: two-tile grid with a masked partial last block (no padding path).
    for B in (8, 5, 532):
        key, kx = jax.random.split(key)
        x = jax.random.normal(kx, (B, C, H, W), jnp.float32)

        out = jax.block_until_ready(mlp_forward(x, params))
        assert out.shape == (B, 10), out.shape

        ref = reference_forward(x, params)
        max_err = float(jnp.max(jnp.abs(out - ref)))
        assert jnp.allclose(out, ref, atol=2e-3, rtol=2e-3), max_err

    print("KERNEL_OK")
</pallas_src>

<mosaic_0001>
module attributes {stable_mosaic.version = 11 : i64} {
  func.func @mlp_kernel(%arg0: i32, %arg1: memref<8x1024xf32, #tpu.memory_space<vmem>>, %arg2: memref<1024x512xbf16, #tpu.memory_space<vmem>>, %arg3: memref<1x512xf32, #tpu.memory_space<vmem>>, %arg4: memref<512x256xbf16, #tpu.memory_space<vmem>>, %arg5: memref<1x256xf32, #tpu.memory_space<vmem>>, %arg6: memref<256x128xbf16, #tpu.memory_space<vmem>>, %arg7: memref<1x128xf32, #tpu.memory_space<vmem>>, %arg8: memref<128x128xbf16, #tpu.memory_space<vmem>>, %arg9: memref<1x128xf32, #tpu.memory_space<vmem>>, %arg10: memref<8x128xf32, #tpu.memory_space<vmem>>) attributes {dimension_semantics = [#tpu.dimension_semantics<parallel>], iteration_bounds = array<i64: 1>, scalar_prefetch = 0 : i64, scratch_operands = 0 : i64, tpu.core_type = #tpu.core_type<tc>, window_params = [{transform_indices = @transform_0, window_bounds = array<i64: 8, 1024>}, {pipeline_mode = #tpu.pipeline_mode<synchronous>, transform_indices = @transform_1, window_bounds = array<i64: 1024, 512>}, {pipeline_mode = #tpu.pipeline_mode<synchronous>, transform_indices = @transform_2, window_bounds = array<i64: 1, 512>}, {pipeline_mode = #tpu.pipeline_mode<synchronous>, transform_indices = @transform_3, window_bounds = array<i64: 512, 256>}, {pipeline_mode = #tpu.pipeline_mode<synchronous>, transform_indices = @transform_4, window_bounds = array<i64: 1, 256>}, {pipeline_mode = #tpu.pipeline_mode<synchronous>, transform_indices = @transform_5, window_bounds = array<i64: 256, 128>}, {pipeline_mode = #tpu.pipeline_mode<synchronous>, transform_indices = @transform_6, window_bounds = array<i64: 1, 128>}, {pipeline_mode = #tpu.pipeline_mode<synchronous>, transform_indices = @transform_7, window_bounds = array<i64: 128, 128>}, {pipeline_mode = #tpu.pipeline_mode<synchronous>, transform_indices = @transform_8, window_bounds = array<i64: 1, 128>}, {transform_indices = @transform_9, window_bounds = array<i64: 8, 128>}]} {
    %c0 = arith.constant 0 : index
    %c0_0 = arith.constant 0 : index
    %0 = vector.load %arg1[%c0, %c0_0] : memref<8x1024xf32, #tpu.memory_space<vmem>>, vector<8x1024xf32>
    %1 = arith.truncf %0 : vector<8x1024xf32> to vector<8x1024xbf16>
    %c0_1 = arith.constant 0 : index
    %c0_2 = arith.constant 0 : index
    %2 = vector.load %arg2[%c0_1, %c0_2] : memref<1024x512xbf16, #tpu.memory_space<vmem>>, vector<1024x512xbf16>
    %cst = arith.constant dense<0.000000e+00> : vector<8x512xf32>
    %3 = tpu.matmul %1, %2, %cst {dimension_numbers = #tpu.dot_dimension_numbers<[1], [0], [0], [1], [0, 0, 1, 1], [], []>} : vector<8x1024xbf16>, vector<1024x512xbf16>, vector<8x512xf32> -> vector<8x512xf32>
    %c0_3 = arith.constant 0 : index
    %c0_4 = arith.constant 0 : index
    %4 = vector.load %arg3[%c0_3, %c0_4] : memref<1x512xf32, #tpu.memory_space<vmem>>, vector<1x512xf32>
    %5 = vector.broadcast %4 : vector<1x512xf32> to vector<8x512xf32>
    %6 = arith.addf %3, %5 : vector<8x512xf32>
    %cst_5 = arith.constant 0.000000e+00 : f32
    %7 = vector.broadcast %cst_5 : f32 to vector<8x512xf32>
    %8 = arith.maximumf %6, %7 : vector<8x512xf32>
    %9 = arith.truncf %8 : vector<8x512xf32> to vector<8x512xbf16>
    %c0_6 = arith.constant 0 : index
    %c0_7 = arith.constant 0 : index
    %10 = vector.load %arg4[%c0_6, %c0_7] : memref<512x256xbf16, #tpu.memory_space<vmem>>, vector<512x256xbf16>
    %cst_8 = arith.constant dense<0.000000e+00> : vector<8x256xf32>
    %11 = tpu.matmul %9, %10, %cst_8 {dimension_numbers = #tpu.dot_dimension_numbers<[1], [0], [0], [1], [0, 0, 1, 1], [], []>} : vector<8x512xbf16>, vector<512x256xbf16>, vector<8x256xf32> -> vector<8x256xf32>
    %c0_9 = arith.constant 0 : index
    %c0_10 = arith.constant 0 : index
    %12 = vector.load %arg5[%c0_9, %c0_10] : memref<1x256xf32, #tpu.memory_space<vmem>>, vector<1x256xf32>
    %13 = vector.broadcast %12 : vector<1x256xf32> to vector<8x256xf32>
    %14 = arith.addf %11, %13 : vector<8x256xf32>
    %cst_11 = arith.constant 0.000000e+00 : f32
    %15 = vector.broadcast %cst_11 : f32 to vector<8x256xf32>
    %16 = arith.maximumf %14, %15 : vector<8x256xf32>
    %17 = arith.truncf %16 : vector<8x256xf32> to vector<8x256xbf16>
    %c0_12 = arith.constant 0 : index
    %c0_13 = arith.constant 0 : index
    %18 = vector.load %arg6[%c0_12, %c0_13] : memref<256x128xbf16, #tpu.memory_space<vmem>>, vector<256x128xbf16>
    %cst_14 = arith.constant dense<0.000000e+00> : vector<8x128xf32>
    %19 = tpu.matmul %17, %18, %cst_14 {dimension_numbers = #tpu.dot_dimension_numbers<[1], [0], [0], [1], [0, 0, 1, 1], [], []>} : vector<8x256xbf16>, vector<256x128xbf16>, vector<8x128xf32> -> vector<8x128xf32>
    %c0_15 = arith.constant 0 : index
    %c0_16 = arith.constant 0 : index
    %20 = vector.load %arg7[%c0_15, %c0_16] : memref<1x128xf32, #tpu.memory_space<vmem>>, vector<1x128xf32>
    %21 = vector.broadcast %20 : vector<1x128xf32> to vector<8x128xf32>
    %22 = arith.addf %19, %21 : vector<8x128xf32>
    %cst_17 = arith.constant 0.000000e+00 : f32
    %23 = vector.broadcast %cst_17 : f32 to vector<8x128xf32>
    %24 = arith.maximumf %22, %23 : vector<8x128xf32>
    %25 = arith.truncf %24 : vector<8x128xf32> to vector<8x128xbf16>
    %c0_18 = arith.constant 0 : index
    %c0_19 = arith.constant 0 : index
    %26 = vector.load %arg8[%c0_18, %c0_19] : memref<128x128xbf16, #tpu.memory_space<vmem>>, vector<128x128xbf16>
    %cst_20 = arith.constant dense<0.000000e+00> : vector<8x128xf32>
    %27 = tpu.matmul %25, %26, %cst_20 {dimension_numbers = #tpu.dot_dimension_numbers<[1], [0], [0], [1], [0, 0, 1, 1], [], []>} : vector<8x128xbf16>, vector<128x128xbf16>, vector<8x128xf32> -> vector<8x128xf32>
    %c0_21 = arith.constant 0 : index
    %c0_22 = arith.constant 0 : index
    %28 = vector.load %arg9[%c0_21, %c0_22] : memref<1x128xf32, #tpu.memory_space<vmem>>, vector<1x128xf32>
    %29 = vector.broadcast %28 : vector<1x128xf32> to vector<8x128xf32>
    %30 = arith.addf %27, %29 : vector<8x128xf32>
    %c0_23 = arith.constant 0 : index
    %c0_24 = arith.constant 0 : index
    %31 = vector.load %arg10[%c0_23, %c0_24] : memref<8x128xf32, #tpu.memory_space<vmem>>, vector<8x128xf32>
    tpu.vector_store %arg10[%c0_23, %c0_24], %30 {strides = array<i32>} : memref<8x128xf32, #tpu.memory_space<vmem>>, vector<8x128xf32>,
    return
  }
  func.func @transform_0(%arg0: i32) -> (i32, i32) {
    %c0_i32 = arith.constant 0 : i32
    %c0_i32_0 = arith.constant 0 : i32
    return %arg0, %c0_i32 : i32, i32
  }
  func.func @transform_1(%arg0: i32) -> (i32, i32) {
    %c0_i32 = arith.constant 0 : i32
    %c0_i32_0 = arith.constant 0 : i32
    %c0_i32_1 = arith.constant 0 : i32
    return %c0_i32, %c0_i32_0 : i32, i32
  }
  func.func @transform_2(%arg0: i32) -> (i32, i32) {
    %c0_i32 = arith.constant 0 : i32
    %c0_i32_0 = arith.constant 0 : i32
    %c0_i32_1 = arith.constant 0 : i32
    return %c0_i32, %c0_i32_0 : i32, i32
  }
  func.func @transform_3(%arg0: i32) -> (i32, i32) {
    %c0_i32 = arith.constant 0 : i32
    %c0_i32_0 = arith.constant 0 : i32
    %c0_i32_1 = arith.constant 0 : i32
    return %c0_i32, %c0_i32_0 : i32, i32
  }
  func.func @transform_4(%arg0: i32) -> (i32, i32) {
    %c0_i32 = arith.constant 0 : i32
    %c0_i32_0 = arith.constant 0 : i32
    %c0_i32_1 = arith.constant 0 : i32
    return %c0_i32, %c0_i32_0 : i32, i32
  }
  func.func @transform_5(%arg0: i32) -> (i32, i32) {
    %c0_i32 = arith.constant 0 : i32
    %c0_i32_0 = arith.constant 0 : i32
    %c0_i32_1 = arith.constant 0 : i32
    return %c0_i32, %c0_i32_0 : i32, i32
  }
  func.func @transform_6(%arg0: i32) -> (i32, i32) {
    %c0_i32 = arith.constant 0 : i32
    %c0_i32_0 = arith.constant 0 : i32
    %c0_i32_1 = arith.constant 0 : i32
    return %c0_i32, %c0_i32_0 : i32, i32
  }
  func.func @transform_7(%arg0: i32) -> (i32, i32) {
    %c0_i32 = arith.constant 0 : i32
    %c0_i32_0 = arith.constant 0 : i32
    %c0_i32_1 = arith.constant 0 : i32
    return %c0_i32, %c0_i32_0 : i32, i32
  }
  func.func @transform_8(%arg0: i32) -> (i32, i32) {
    %c0_i32 = arith.constant 0 : i32
    %c0_i32_0 = arith.constant 0 : i32
    %c0_i32_1 = arith.constant 0 : i32
    return %c0_i32, %c0_i32_0 : i32, i32
  }
  func.func @transform_9(%arg0: i32) -> (i32, i32) {
    %c0_i32 = arith.constant 0 : i32
    %c0_i32_0 = arith.constant 0 : i32
    return %arg0, %c0_i32 : i32, i32
  }
}

</mosaic_0001>

<bundles_post_ra>
// kernel: mlp_forward.1
= control target key start
LH: loop header
LB: loop body
LE: loop exit
PB: predicated region body
PF: predicated region fallthrough
CT: control target
= control target key end

     0   :  { %s4843_s0 = inlined_call_operand.vmem [shape: f32[8,1024], index: 0, kind: input, shape index: {}]   ;;  %s4844_s1 = inlined_call_operand.vmem [shape: bf16[1024,512], index: 1, kind: input, shape index: {}]   ;;  %s4845_s2 = inlined_call_operand.vmem [shape: f32[1,512], index: 2, kind: input, shape index: {}]   ;;  %s4846_s3 = inlined_call_operand.vmem [shape: bf16[512,256], index: 3, kind: input, shape index: {}]   ;;  %s4847_s4 = inlined_call_operand.vmem [shape: f32[1,256], index: 4, kind: input, shape index: {}]   ;;  %s4848_s5 = inlined_call_operand.vmem [shape: bf16[256,128], index: 5, kind: input, shape index: {}]   ;;  %s4849_s6 = inlined_call_operand.vmem [shape: f32[1,128], index: 6, kind: input, shape index: {}]   ;;  %s4850_s7 = inlined_call_operand.vmem [shape: bf16[128,128], index: 7, kind: input, shape index: {}]   ;;  %s4851_s8 = inlined_call_operand.vmem [shape: f32[1,128], index: 8, kind: input, shape index: {}]   ;;  %s4852_s9 = inlined_call_operand.hbm [shape: f32[8,128], index: 9, kind: output, shape index: {}]  }
   0x1   :  { %v3129_v0 = vld [vmem:[%s4844_s1 + $0xe4] ss:$16 sps:$4 sm:$0xff]   ;;  %v3133_v2 = vld [vmem:[%s4844_s1 + $0xe0] ss:$16 sps:$4 sm:$0xff]   ;;  %v35_v46 = vld [vmem:[%s4843_s0 + $0x8] sm:$0xff] }
   0x2   :  { %v3131_v1 = vld [vmem:[%s4844_s1 + $0x2e4] ss:$16 sps:$4 sm:$0xff]   ;;  %1608 = vmatprep.subr.bf16.mxu0 %v3129_v0  ;;  %v3134_v3 = vld [vmem:[%s4844_s1 + $0x2e0] ss:$16 sps:$4 sm:$0xff]   ;;  %v3855_v49 = vpack.c.bf16 %v35_v46, %v35_v46  ;;  %v37_v50 = vld [vmem:[%s4843_s0 + $0x18] sm:$0xff] }
   0x3   :  { %1649 = vmatprep.subr.bf16.mxu1 %v3131_v1  ;;  %v3135_v4 = vld [vmem:[%s4844_s1 + $0xc4] ss:$16 sps:$4 sm:$0xff]   ;;  %1609 = vmatpush1.bf16.msra.mxu0 %v3133_v2  ;;  %v3139_v6 = vld [vmem:[%s4844_s1 + $0xc0] ss:$16 sps:$4 sm:$0xff]   ;;  %v3863_v52 = vpack.c.bf16 %v37_v50, %v37_v50 }
   0x4   :  { %1650 = vmatpush1.bf16.msra.mxu1 %v3134_v3  ;;  %v3137_v5 = vld [vmem:[%s4844_s1 + $0x2c4] ss:$16 sps:$4 sm:$0xff]   ;;  %1610 = vmatprep.subr.bf16.mxu0 %v3135_v4  ;;  %v3140_v7 = vld [vmem:[%s4844_s1 + $0x2c0] ss:$16 sps:$4 sm:$0xff]  }
   0x5   :  { %1651 = vmatprep.subr.bf16.mxu1 %v3137_v5  ;;  %v3141_v8 = vld [vmem:[%s4844_s1 + $0xa4] ss:$16 sps:$4 sm:$0xff]   ;;  %v3145_v10 = vld [vmem:[%s4844_s1 + $0xa0] ss:$16 sps:$4 sm:$0xff]   ;;  %1640 = vmatprep.mubr.bf16.mxu0 %v3855_v49 }
   0x6   :  { %v3143_v9 = vld [vmem:[%s4844_s1 + $0x2a4] ss:$16 sps:$4 sm:$0xff]   ;;  %v3146_v11 = vld [vmem:[%s4844_s1 + $0x2a0] ss:$16 sps:$4 sm:$0xff]   ;;  %1681 = vmatprep.mubr.bf16.mxu1 %v3863_v52 }
   0x7   :  { %1611 = vmatpush1.bf16.msra.mxu0 %v3139_v6  ;;  %v3147_v12 = vld [vmem:[%s4844_s1 + $0x84] ss:$16 sps:$4 sm:$0xff]   ;;  %v3151_v14 = vld [vmem:[%s4844_s1 + $0x80] ss:$16 sps:$4 sm:$0xff]  }
   0x8   :  { %1652 = vmatpush1.bf16.msra.mxu1 %v3140_v7  ;;  %1612 = vmatprep.subr.bf16.mxu0 %v3141_v8  ;;  %v3149_v13 = vld [vmem:[%s4844_s1 + $0x284] ss:$16 sps:$4 sm:$0xff]   ;;  %v3152_v15 = vld [vmem:[%s4844_s1 + $0x280] ss:$16 sps:$4 sm:$0xff]  }
   0x9   :  { %1653 = vmatprep.subr.bf16.mxu1 %v3143_v9  ;;  %v3153_v16 = vld [vmem:[%s4844_s1 + $0x64] ss:$16 sps:$4 sm:$0xff]   ;;  %v3157_v18 = vld [vmem:[%s4844_s1 + $0x60] ss:$16 sps:$4 sm:$0xff]  }
   0xa   :  { %v3155_v17 = vld [vmem:[%s4844_s1 + $0x264] ss:$16 sps:$4 sm:$0xff]   ;;  %v3158_v19 = vld [vmem:[%s4844_s1 + $0x260] ss:$16 sps:$4 sm:$0xff]  }
   0xb   :  { %1613 = vmatpush1.bf16.msra.mxu0 %v3145_v10  ;;  %v3159_v20 = vld [vmem:[%s4844_s1 + $0x44] ss:$16 sps:$4 sm:$0xff]   ;;  %v3163_v22 = vld [vmem:[%s4844_s1 + $0x40] ss:$16 sps:$4 sm:$0xff]  }
   0xc   :  { %1654 = vmatpush1.bf16.msra.mxu1 %v3146_v11  ;;  %1614 = vmatprep.subr.bf16.mxu0 %v3147_v12  ;;  %v3161_v21 = vld [vmem:[%s4844_s1 + $0x244] ss:$16 sps:$4 sm:$0xff]   ;;  %v3164_v23 = vld [vmem:[%s4844_s1 + $0x240] ss:$16 sps:$4 sm:$0xff]  }
   0xd   :  { %1655 = vmatprep.subr.bf16.mxu1 %v3149_v13  ;;  %v3165_v24 = vld [vmem:[%s4844_s1 + $0x24] ss:$16 sps:$4 sm:$0xff]   ;;  %v3169_v26 = vld [vmem:[%s4844_s1 + $0x20] ss:$16 sps:$4 sm:$0xff]  }
   0xe   :  { %v3167_v25 = vld [vmem:[%s4844_s1 + $0x224] ss:$16 sps:$4 sm:$0xff]   ;;  %v3170_v27 = vld [vmem:[%s4844_s1 + $0x220] ss:$16 sps:$4 sm:$0xff]  }
   0xf   :  { %1615 = vmatpush1.bf16.msra.mxu0 %v3151_v14  ;;  %v3171_v28 = vld [vmem:[%s4844_s1 + $0x4] ss:$16 sps:$4 sm:$0xff]   ;;  %v3175_v30 = vld [vmem:[%s4844_s1] ss:$16 sps:$4 sm:$0xff]  }
  0x10   :  { %1656 = vmatpush1.bf16.msra.mxu1 %v3152_v15  ;;  %1616 = vmatprep.subr.bf16.mxu0 %v3153_v16  ;;  %v3173_v29 = vld [vmem:[%s4844_s1 + $0x204] ss:$16 sps:$4 sm:$0xff]   ;;  %v3176_v31 = vld [vmem:[%s4844_s1 + $0x200] ss:$16 sps:$4 sm:$0xff]  }
  0x11   :  { %1657 = vmatprep.subr.bf16.mxu1 %v3155_v17  ;;  %v3177_v32 = vld [vmem:[%s4844_s1 + $0x1e4] ss:$16 sps:$4 sm:$0xff]   ;;  %v3181_v34 = vld [vmem:[%s4844_s1 + $0x1e0] ss:$16 sps:$4 sm:$0xff]  }
  0x12   :  { %v3179_v33 = vld [vmem:[%s4844_s1 + $0x3e4] ss:$16 sps:$4 sm:$0xff]   ;;  %v3182_v35 = vld [vmem:[%s4844_s1 + $0x3e0] ss:$16 sps:$4 sm:$0xff]  }
  0x13   :  { %1617 = vmatpush1.bf16.msra.mxu0 %v3157_v18  ;;  %v3183_v36 = vld [vmem:[%s4844_s1 + $0x1c4] ss:$16 sps:$4 sm:$0xff]   ;;  %v3187_v38 = vld [vmem:[%s4844_s1 + $0x1c0] ss:$16 sps:$4 sm:$0xff]  }
  0x14   :  { %1658 = vmatpush1.bf16.msra.mxu1 %v3158_v19  ;;  %1618 = vmatprep.subr.bf16.mxu0 %v3159_v20  ;;  %v3185_v37 = vld [vmem:[%s4844_s1 + $0x3c4] ss:$16 sps:$4 sm:$0xff]   ;;  %v3188_v39 = vld [vmem:[%s4844_s1 + $0x3c0] ss:$16 sps:$4 sm:$0xff]  }
  0x15   :  { %1659 = vmatprep.subr.bf16.mxu1 %v3161_v21  ;;  %v3189_v40 = vld [vmem:[%s4844_s1 + $0x1a4] ss:$16 sps:$4 sm:$0xff]   ;;  %v3193_v42 = vld [vmem:[%s4844_s1 + $0x1a0] ss:$16 sps:$4 sm:$0xff]  }
  0x16   :  { %v3191_v41 = vld [vmem:[%s4844_s1 + $0x3a4] ss:$16 sps:$4 sm:$0xff]   ;;  %v3194_v43 = vld [vmem:[%s4844_s1 + $0x3a0] ss:$16 sps:$4 sm:$0xff]  }
  0x17   :  { %1619 = vmatpush1.bf16.msra.mxu0 %v3163_v22  ;;  %v3195_v44 = vld [vmem:[%s4844_s1 + $0x184] ss:$16 sps:$4 sm:$0xff]   ;;  %v3199_v47 = vld [vmem:[%s4844_s1 + $0x180] ss:$16 sps:$4 sm:$0xff]  }
  0x18   :  { %1660 = vmatpush1.bf16.msra.mxu1 %v3164_v23  ;;  %1620 = vmatprep.subr.bf16.mxu0 %v3165_v24  ;;  %v3197_v45 = vld [vmem:[%s4844_s1 + $0x384] ss:$16 sps:$4 sm:$0xff]   ;;  %v3200_v48 = vld [vmem:[%s4844_s1 + $0x380] ss:$16 sps:$4 sm:$0xff]  }
  0x19   :  { %1661 = vmatprep.subr.bf16.mxu1 %v3167_v25  ;;  %v3201_v51 = vld [vmem:[%s4844_s1 + $0x164] ss:$16 sps:$4 sm:$0xff]   ;;  %v3205_v54 = vld [vmem:[%s4844_s1 + $0x160] ss:$16 sps:$4 sm:$0xff]  }
  0x1a   :  { %v3203_v53 = vld [vmem:[%s4844_s1 + $0x364] ss:$16 sps:$4 sm:$0xff]   ;;  %v3206_v55 = vld [vmem:[%s4844_s1 + $0x360] ss:$16 sps:$4 sm:$0xff]  }
  0x1b   :  { %1621 = vmatpush1.bf16.msra.mxu0 %v3169_v26  ;;  %v3207_v56 = vld [vmem:[%s4844_s1 + $0x144] ss:$16 sps:$4 sm:$0xff]   ;;  %v3211_v58 = vld [vmem:[%s4844_s1 + $0x140] ss:$16 sps:$4 sm:$0xff]  }
  0x1c   :  { %1662 = vmatpush1.bf16.msra.mxu1 %v3170_v27  ;;  %1622 = vmatprep.subr.bf16.mxu0 %v3171_v28  ;;  %v3209_v57 = vld [vmem:[%s4844_s1 + $0x344] ss:$16 sps:$4 sm:$0xff]   ;;  %v3212_v59 = vld [vmem:[%s4844_s1 + $0x340] ss:$16 sps:$4 sm:$0xff]  }
  0x1d   :  { %1663 = vmatprep.subr.bf16.mxu1 %v3173_v29  ;;  %v3213_v60 = vld [vmem:[%s4844_s1 + $0x124] ss:$16 sps:$4 sm:$0xff]   ;;  %v3217_v62 = vld [vmem:[%s4844_s1 + $0x120] ss:$16 sps:$4 sm:$0xff]  }
  0x1e   :  { %v3215_v61 = vld [vmem:[%s4844_s1 + $0x324] ss:$16 sps:$4 sm:$0xff]   ;;  %v3218_v63 = vld [vmem:[%s4844_s1 + $0x320] ss:$16 sps:$4 sm:$0xff]  }
  0x1f   :  { %1623 = vmatpush1.bf16.msra.mxu0 %v3175_v30  ;;  %v3219_v0 = vld [vmem:[%s4844_s1 + $0x104] ss:$16 sps:$4 sm:$0xff]   ;;  %v3223_v2 = vld [vmem:[%s4844_s1 + $0x100] ss:$16 sps:$4 sm:$0xff]  }
  0x20   :  { %1664 = vmatpush1.bf16.msra.mxu1 %v3176_v31  ;;  %1624 = vmatprep.subr.bf16.mxu0 %v3177_v32  ;;  %v3221_v1 = vld [vmem:[%s4844_s1 + $0x304] ss:$16 sps:$4 sm:$0xff]   ;;  %v3224_v3 = vld [vmem:[%s4844_s1 + $0x300] ss:$16 sps:$4 sm:$0xff]  }
  0x21   :  { %1665 = vmatprep.subr.bf16.mxu1 %v3179_v33  ;;  %v34_v4 = vld [vmem:[%s4843_s0] sm:$0xff]  ;;  %v36_v5 = vld [vmem:[%s4843_s0 + $0x10] sm:$0xff] }
  0x22   :  { %v3227_v6 = vld [vmem:[%s4844_s1 + $0x4e4] ss:$16 sps:$4 sm:$0xff]   ;;  %v3924_v8 = vpack.c.bf16 %v34_v4, %v34_v4  ;;  %v3926_v9 = vpack.c.bf16 %v36_v5, %v36_v5  ;;  %v3225_v10 = vld [vmem:[%s4844_s1 + $0x4e0] ss:$16 sps:$4 sm:$0xff]  }
  0x23   :  { %1625 = vmatpush2.bf16.msra.mxu0 %v3181_v34  ;;  %v3230_v7 = vld [vmem:[%s4844_s1 + $0x6e4] ss:$16 sps:$4 sm:$0xff]   ;;  %v3228_v11 = vld [vmem:[%s4844_s1 + $0x6e0] ss:$16 sps:$4 sm:$0xff]   ;;  %v39_v34 = vld [vmem:[%s4843_s0 + $0x28] sm:$0xff] }
  0x24   :  { %1666 = vmatpush2.bf16.msra.mxu1 %v3182_v35  ;;  %1626 = vmatprep.subr.bf16.mxu0 %v3183_v36  ;;  %v3233_v12 = vld [vmem:[%s4844_s1 + $0x4c4] ss:$16 sps:$4 sm:$0xff]   ;;  %v3231_v14 = vld [vmem:[%s4844_s1 + $0x4c0] ss:$16 sps:$4 sm:$0xff]  }
  0x25   :  { %1667 = vmatprep.subr.bf16.mxu1 %v3185_v37  ;;  %v3236_v13 = vld [vmem:[%s4844_s1 + $0x6c4] ss:$16 sps:$4 sm:$0xff]   ;;  %v3234_v15 = vld [vmem:[%s4844_s1 + $0x6c0] ss:$16 sps:$4 sm:$0xff]   ;;  %v4011_v37 = vpack.c.bf16 %v39_v34, %v39_v34  ;;  %v3347_v34 = vld [vmem:[%s4844_s1 + $0x6c] ss:$16 sps:$4 sm:$0xff]  }
  0x26   :  { %v3239_v16 = vld [vmem:[%s4844_s1 + $0x4a4] ss:$16 sps:$4 sm:$0xff]   ;;  %v3237_v18 = vld [vmem:[%s4844_s1 + $0x4a0] ss:$16 sps:$4 sm:$0xff]  }
  0x27   :  { %1627 = vmatpush2.bf16.msra.mxu0 %v3187_v38  ;;  %v3242_v17 = vld [vmem:[%s4844_s1 + $0x6a4] ss:$16 sps:$4 sm:$0xff]   ;;  %v3240_v19 = vld [vmem:[%s4844_s1 + $0x6a0] ss:$16 sps:$4 sm:$0xff]   ;;  %v41_v38 = vld [vmem:[%s4843_s0 + $0x38] sm:$0xff] }
  0x28   :  { %1668 = vmatpush2.bf16.msra.mxu1 %v3188_v39  ;;  %1628 = vmatprep.subr.bf16.mxu0 %v3189_v40  ;;  %v3245_v20 = vld [vmem:[%s4844_s1 + $0x484] ss:$16 sps:$4 sm:$0xff]   ;;  %v3243_v22 = vld [vmem:[%s4844_s1 + $0x480] ss:$16 sps:$4 sm:$0xff]   ;;  %v4019_v40 = vpack.c.bf16 %v41_v38, %v41_v38  ;;  %v3348_v38 = vld [vmem:[%s4844_s1 + $0x268] ss:$16 sps:$4 sm:$0xff]  }
  0x29   :  { %1669 = vmatprep.subr.bf16.mxu1 %v3191_v41  ;;  %v3248_v21 = vld [vmem:[%s4844_s1 + $0x684] ss:$16 sps:$4 sm:$0xff]   ;;  %v3246_v23 = vld [vmem:[%s4844_s1 + $0x680] ss:$16 sps:$4 sm:$0xff]  }
  0x2a   :  { %v3251_v24 = vld [vmem:[%s4844_s1 + $0x464] ss:$16 sps:$4 sm:$0xff]   ;;  %v3249_v26 = vld [vmem:[%s4844_s1 + $0x460] ss:$16 sps:$4 sm:$0xff]  }
  0x2b   :  { %1629 = vmatpush2.bf16.msra.mxu0 %v3193_v42  ;;  %v3254_v25 = vld [vmem:[%s4844_s1 + $0x664] ss:$16 sps:$4 sm:$0xff]   ;;  %v3252_v27 = vld [vmem:[%s4844_s1 + $0x660] ss:$16 sps:$4 sm:$0xff]  }
  0x2c   :  { %1670 = vmatpush2.bf16.msra.mxu1 %v3194_v43  ;;  %1630 = vmatprep.subr.bf16.mxu0 %v3195_v44  ;;  %v3257_v28 = vld [vmem:[%s4844_s1 + $0x444] ss:$16 sps:$4 sm:$0xff]   ;;  %v3255_v30 = vld [vmem:[%s4844_s1 + $0x440] ss:$16 sps:$4 sm:$0xff]  }
  0x2d   :  { %1671 = vmatprep.subr.bf16.mxu1 %v3197_v45  ;;  %v3260_v29 = vld [vmem:[%s4844_s1 + $0x644] ss:$16 sps:$4 sm:$0xff]   ;;  %v3258_v31 = vld [vmem:[%s4844_s1 + $0x640] ss:$16 sps:$4 sm:$0xff]  }
  0x2e   :  { %v3263_v32 = vld [vmem:[%s4844_s1 + $0x424] ss:$16 sps:$4 sm:$0xff]   ;;  %v3261_v35 = vld [vmem:[%s4844_s1 + $0x420] ss:$16 sps:$4 sm:$0xff]  }
  0x2f   :  { %1631 = vmatpush2.bf16.msra.mxu0 %v3199_v47  ;;  %v3266_v33 = vld [vmem:[%s4844_s1 + $0x624] ss:$16 sps:$4 sm:$0xff]   ;;  %v3264_v36 = vld [vmem:[%s4844_s1 + $0x620] ss:$16 sps:$4 sm:$0xff]  }
  0x30   :  { %1672 = vmatpush2.bf16.msra.mxu1 %v3200_v48  ;;  %1632 = vmatprep.subr.bf16.mxu0 %v3201_v51  ;;  %v3269_v39 = vld [vmem:[%s4844_s1 + $0x404] ss:$16 sps:$4 sm:$0xff]   ;;  %v3267_v42 = vld [vmem:[%s4844_s1 + $0x400] ss:$16 sps:$4 sm:$0xff]  }
  0x31   :  { %1673 = vmatprep.subr.bf16.mxu1 %v3203_v53  ;;  %v3272_v41 = vld [vmem:[%s4844_s1 + $0x604] ss:$16 sps:$4 sm:$0xff]   ;;  %v3270_v43 = vld [vmem:[%s4844_s1 + $0x600] ss:$16 sps:$4 sm:$0xff]  }
  0x32   :  { %v3275_v44 = vld [vmem:[%s4844_s1 + $0x5e4] ss:$16 sps:$4 sm:$0xff]   ;;  %v3273_v46 = vld [vmem:[%s4844_s1 + $0x5e0] ss:$16 sps:$4 sm:$0xff]  }
  0x33   :  { %1633 = vmatpush2.bf16.msra.mxu0 %v3205_v54  ;;  %v3278_v45 = vld [vmem:[%s4844_s1 + $0x7e4] ss:$16 sps:$4 sm:$0xff]   ;;  %v3276_v47 = vld [vmem:[%s4844_s1 + $0x7e0] ss:$16 sps:$4 sm:$0xff]  }
  0x34   :  { %1674 = vmatpush2.bf16.msra.mxu1 %v3206_v55  ;;  %1634 = vmatprep.subr.bf16.mxu0 %v3207_v56  ;;  %v3281_v48 = vld [vmem:[%s4844_s1 + $0x5c4] ss:$16 sps:$4 sm:$0xff]   ;;  %v3279_v51 = vld [vmem:[%s4844_s1 + $0x5c0] ss:$16 sps:$4 sm:$0xff]  }
  0x35   :  { %1675 = vmatprep.subr.bf16.mxu1 %v3209_v57  ;;  %v3284_v50 = vld [vmem:[%s4844_s1 + $0x7c4] ss:$16 sps:$4 sm:$0xff]   ;;  %v3282_v53 = vld [vmem:[%s4844_s1 + $0x7c0] ss:$16 sps:$4 sm:$0xff]  }
  0x36   :  { %v3287_v54 = vld [vmem:[%s4844_s1 + $0x5a4] ss:$16 sps:$4 sm:$0xff]   ;;  %v3285_v56 = vld [vmem:[%s4844_s1 + $0x5a0] ss:$16 sps:$4 sm:$0xff]  }
  0x37   :  { %1635 = vmatpush2.bf16.msra.mxu0 %v3211_v58  ;;  %v3290_v55 = vld [vmem:[%s4844_s1 + $0x7a4] ss:$16 sps:$4 sm:$0xff]   ;;  %v3288_v57 = vld [vmem:[%s4844_s1 + $0x7a0] ss:$16 sps:$4 sm:$0xff]  }
  0x38   :  { %1676 = vmatpush2.bf16.msra.mxu1 %v3212_v59  ;;  %1636 = vmatprep.subr.bf16.mxu0 %v3213_v60  ;;  %v3293_v58 = vld [vmem:[%s4844_s1 + $0x584] ss:$16 sps:$4 sm:$0xff]   ;;  %v3291_v60 = vld [vmem:[%s4844_s1 + $0x580] ss:$16 sps:$4 sm:$0xff]  }
  0x39   :  { %1677 = vmatprep.subr.bf16.mxu1 %v3215_v61  ;;  %v3296_v59 = vld [vmem:[%s4844_s1 + $0x784] ss:$16 sps:$4 sm:$0xff]   ;;  %v3294_v61 = vld [vmem:[%s4844_s1 + $0x780] ss:$16 sps:$4 sm:$0xff]  }
  0x3a   :  { %v3303_v4 = vld [vmem:[%s4844_s1 + $0x540] ss:$16 sps:$4 sm:$0xff]  }
  0x3b   :  { %1637 = vmatpush2.bf16.msra.mxu0 %v3217_v62  ;;  %v3299_v62 = vld [vmem:[%s4844_s1 + $0x564] ss:$16 sps:$4 sm:$0xff]   ;;  %v3306_v5 = vld [vmem:[%s4844_s1 + $0x740] ss:$16 sps:$4 sm:$0xff]  }
  0x3c   :  { %1678 = vmatpush2.bf16.msra.mxu1 %v3218_v63  ;;  %1638 = vmatprep.subr.bf16.mxu0 %v3219_v0  ;;  %v3302_v63 = vld [vmem:[%s4844_s1 + $0x764] ss:$16 sps:$4 sm:$0xff]   ;;  %v3297_v0 = vld [vmem:[%s4844_s1 + $0x560] ss:$16 sps:$4 sm:$0xff]  }
  0x3d   :  { %1679 = vmatprep.subr.bf16.mxu1 %v3221_v1  ;;  %v3300_v1 = vld [vmem:[%s4844_s1 + $0x760] ss:$16 sps:$4 sm:$0xff]  }
  0x3f   :  { %1639 = vmatpush2.bf16.msra.mxu0 %v3223_v2  ;;  %v3305_v2 = vld [vmem:[%s4844_s1 + $0x544] ss:$16 sps:$4 sm:$0xff]  }
  0x40   :  { %1680 = vmatpush2.bf16.msra.mxu1 %v3224_v3  ;;  %1690 = vmatprep.subr.bf16.mxu0 %v3227_v6  ;;  %v3308_v3 = vld [vmem:[%s4844_s1 + $0x744] ss:$16 sps:$4 sm:$0xff]  }
  0x41   :  { %1731 = vmatprep.subr.bf16.mxu1 %v3230_v7  ;;  %v3311_v6 = vld [vmem:[%s4844_s1 + $0x524] ss:$16 sps:$4 sm:$0xff]  }
  0x42   :  { %1641 = vmatmul.mubr.bf16.vlgmr.msra.gmra.mxu0 %v3924_v8  ;;  %v3314_v7 = vld [vmem:[%s4844_s1 + $0x724] ss:$16 sps:$4 sm:$0xff]  }
  0x43   :  { %1682 = vmatmul.mubr.bf16.vlgmr.msra.gmra.mxu1 %v3926_v9  ;;  %1691 = vmatpush1.bf16.msra.mxu0 %v3225_v10  ;;  %v3309_v10 = vld [vmem:[%s4844_s1 + $0x520] ss:$16 sps:$4 sm:$0xff]  }
  0x44   :  { %1732 = vmatpush1.bf16.msra.mxu1 %v3228_v11  ;;  %1692 = vmatprep.subr.bf16.mxu0 %v3233_v12  ;;  %v3312_v11 = vld [vmem:[%s4844_s1 + $0x720] ss:$16 sps:$4 sm:$0xff]   ;;  %v3317_v12 = vld [vmem:[%s4844_s1 + $0x504] ss:$16 sps:$4 sm:$0xff]  }
  0x45   :  { %1733 = vmatprep.subr.bf16.mxu1 %v3236_v13  ;;  %1722 = vmatprep.mubr.bf16.mxu0 %v4011_v37  ;;  %v3320_v13 = vld [vmem:[%s4844_s1 + $0x704] ss:$16 sps:$4 sm:$0xff]  }
  0x46   :  { %1763 = vmatprep.mubr.bf16.mxu1 %v4019_v40 }
  0x47   :  { %1693 = vmatpush1.bf16.msra.mxu0 %v3231_v14  ;;  %v3315_v14 = vld [vmem:[%s4844_s1 + $0x500] ss:$16 sps:$4 sm:$0xff]  }
  0x48   :  { %1734 = vmatpush1.bf16.msra.mxu1 %v3234_v15  ;;  %1694 = vmatprep.subr.bf16.mxu0 %v3239_v16  ;;  %v3318_v15 = vld [vmem:[%s4844_s1 + $0x700] ss:$16 sps:$4 sm:$0xff]  }
  0x49   :  { %1735 = vmatprep.subr.bf16.mxu1 %v3242_v17  ;;  %v38_v16 = vld [vmem:[%s4843_s0 + $0x20] sm:$0xff]  ;;  %v40_v17 = vld [vmem:[%s4843_s0 + $0x30] sm:$0xff] }
  0x4b   :  { %1695 = vmatpush1.bf16.msra.mxu0 %v3237_v18  ;;  %v3323_v18 = vld [vmem:[%s4844_s1 + $0xec] ss:$16 sps:$4 sm:$0xff]  }
  0x4c   :  { %1736 = vmatpush1.bf16.msra.mxu1 %v3240_v19  ;;  %1696 = vmatprep.subr.bf16.mxu0 %v3245_v20  ;;  %v3326_v19 = vld [vmem:[%s4844_s1 + $0x2ec] ss:$16 sps:$4 sm:$0xff]   ;;  %v4140_v20 = vpack.c.bf16 %v38_v16, %v38_v16 }
  0x4d   :  { %1737 = vmatprep.subr.bf16.mxu1 %v3248_v21  ;;  %v4142_v21 = vpack.c.bf16 %v40_v17, %v40_v17  ;;  %v3407_v16 = vld [vmem:[%s4844_s1 + $0x12c] ss:$16 sps:$4 sm:$0xff]  }
  0x4e   :  { %v3410_v17 = vld [vmem:[%s4844_s1 + $0x32c] ss:$16 sps:$4 sm:$0xff]  }
  0x4f   :  { %1697 = vmatpush1.bf16.msra.mxu0 %v3243_v22  ;;  %v3321_v22 = vld [vmem:[%s4844_s1 + $0xe8] ss:$16 sps:$4 sm:$0xff]  }
  0x50   :  { %1738 = vmatpush1.bf16.msra.mxu1 %v3246_v23  ;;  %1698 = vmatprep.subr.bf16.mxu0 %v3251_v24  ;;  %v3324_v23 = vld [vmem:[%s4844_s1 + $0x2e8] ss:$16 sps:$4 sm:$0xff]   ;;  %v3329_v24 = vld [vmem:[%s4844_s1 + $0xcc] ss:$16 sps:$4 sm:$0xff]  }
  0x51   :  { %1739 = vmatprep.subr.bf16.mxu1 %v3254_v25  ;;  %v3332_v25 = vld [vmem:[%s4844_s1 + $0x2cc] ss:$16 sps:$4 sm:$0xff]  }
  0x53   :  { %1699 = vmatpush1.bf16.msra.mxu0 %v3249_v26  ;;  %v3327_v26 = vld [vmem:[%s4844_s1 + $0xc8] ss:$16 sps:$4 sm:$0xff]  }
  0x54   :  { %1740 = vmatpush1.bf16.msra.mxu1 %v3252_v27  ;;  %1700 = vmatprep.subr.bf16.mxu0 %v3257_v28  ;;  %v3330_v27 = vld [vmem:[%s4844_s1 + $0x2c8] ss:$16 sps:$4 sm:$0xff]   ;;  %v3335_v28 = vld [vmem:[%s4844_s1 + $0xac] ss:$16 sps:$4 sm:$0xff]  }
  0x55   :  { %1741 = vmatprep.subr.bf16.mxu1 %v3260_v29  ;;  %v3338_v29 = vld [vmem:[%s4844_s1 + $0x2ac] ss:$16 sps:$4 sm:$0xff]  }
  0x57   :  { %1701 = vmatpush1.bf16.msra.mxu0 %v3255_v30  ;;  %v3333_v30 = vld [vmem:[%s4844_s1 + $0xa8] ss:$16 sps:$4 sm:$0xff]  }
  0x58   :  { %1742 = vmatpush1.bf16.msra.mxu1 %v3258_v31  ;;  %1702 = vmatprep.subr.bf16.mxu0 %v3263_v32  ;;  %v3336_v31 = vld [vmem:[%s4844_s1 + $0x2a8] ss:$16 sps:$4 sm:$0xff]   ;;  %v3341_v32 = vld [vmem:[%s4844_s1 + $0x8c] ss:$16 sps:$4 sm:$0xff]  }
  0x59   :  { %1743 = vmatprep.subr.bf16.mxu1 %v3266_v33  ;;  %v3342_v33 = vld [vmem:[%s4844_s1 + $0x288] ss:$16 sps:$4 sm:$0xff]  }
  0x5b   :  { %1703 = vmatpush1.bf16.msra.mxu0 %v3261_v35  ;;  %v3350_v35 = vld [vmem:[%s4844_s1 + $0x26c] ss:$16 sps:$4 sm:$0xff]  }
  0x5c   :  { %1744 = vmatpush1.bf16.msra.mxu1 %v3264_v36  ;;  %1704 = vmatprep.subr.bf16.mxu0 %v3269_v39  ;;  %v3345_v36 = vld [vmem:[%s4844_s1 + $0x68] ss:$16 sps:$4 sm:$0xff]   ;;  %v3353_v39 = vld [vmem:[%s4844_s1 + $0x4c] ss:$16 sps:$4 sm:$0xff]  }
  0x5d   :  { %1745 = vmatprep.subr.bf16.mxu1 %v3272_v41  ;;  %v3356_v41 = vld [vmem:[%s4844_s1 + $0x24c] ss:$16 sps:$4 sm:$0xff]  }
  0x5f   :  { %1705 = vmatpush1.bf16.msra.mxu0 %v3267_v42  ;;  %v3351_v42 = vld [vmem:[%s4844_s1 + $0x48] ss:$16 sps:$4 sm:$0xff]  }
  0x60   :  { %1746 = vmatpush1.bf16.msra.mxu1 %v3270_v43  ;;  %1706 = vmatprep.subr.bf16.mxu0 %v3275_v44  ;;  %v3354_v43 = vld [vmem:[%s4844_s1 + $0x248] ss:$16 sps:$4 sm:$0xff]   ;;  %v3359_v44 = vld [vmem:[%s4844_s1 + $0x2c] ss:$16 sps:$4 sm:$0xff]  }
  0x61   :  { %1747 = vmatprep.subr.bf16.mxu1 %v3278_v45  ;;  %v3362_v45 = vld [vmem:[%s4844_s1 + $0x22c] ss:$16 sps:$4 sm:$0xff]  }
  0x63   :  { %1707 = vmatpush2.bf16.msra.mxu0 %v3273_v46  ;;  %v3357_v46 = vld [vmem:[%s4844_s1 + $0x28] ss:$16 sps:$4 sm:$0xff]  }
  0x64   :  { %1748 = vmatpush2.bf16.msra.mxu1 %v3276_v47  ;;  %1708 = vmatprep.subr.bf16.mxu0 %v3281_v48  ;;  %v3360_v47 = vld [vmem:[%s4844_s1 + $0x228] ss:$16 sps:$4 sm:$0xff]   ;;  %v3365_v48 = vld [vmem:[%s4844_s1 + $0xc] ss:$16 sps:$4 sm:$0xff]  }
  0x65   :  { %1749 = vmatprep.subr.bf16.mxu1 %v3284_v50  ;;  %v3368_v50 = vld [vmem:[%s4844_s1 + $0x20c] ss:$16 sps:$4 sm:$0xff]  }
  0x67   :  { %1709 = vmatpush2.bf16.msra.mxu0 %v3279_v51  ;;  %v3363_v51 = vld [vmem:[%s4844_s1 + $0x8] ss:$16 sps:$4 sm:$0xff]  }
  0x68   :  { %1750 = vmatpush2.bf16.msra.mxu1 %v3282_v53  ;;  %1710 = vmatprep.subr.bf16.mxu0 %v3287_v54  ;;  %v3366_v53 = vld [vmem:[%s4844_s1 + $0x208] ss:$16 sps:$4 sm:$0xff]   ;;  %v3371_v54 = vld [vmem:[%s4844_s1 + $0x1ec] ss:$16 sps:$4 sm:$0xff]  }
  0x69   :  { %1751 = vmatprep.subr.bf16.mxu1 %v3290_v55  ;;  %v3374_v55 = vld [vmem:[%s4844_s1 + $0x3ec] ss:$16 sps:$4 sm:$0xff]  }
  0x6b   :  { %1711 = vmatpush2.bf16.msra.mxu0 %v3285_v56  ;;  %v3369_v56 = vld [vmem:[%s4844_s1 + $0x1e8] ss:$16 sps:$4 sm:$0xff]  }
  0x6c   :  { %1752 = vmatpush2.bf16.msra.mxu1 %v3288_v57  ;;  %1712 = vmatprep.subr.bf16.mxu0 %v3293_v58  ;;  %v3372_v57 = vld [vmem:[%s4844_s1 + $0x3e8] ss:$16 sps:$4 sm:$0xff]   ;;  %v3377_v58 = vld [vmem:[%s4844_s1 + $0x1cc] ss:$16 sps:$4 sm:$0xff]  }
  0x6d   :  { %1753 = vmatprep.subr.bf16.mxu1 %v3296_v59  ;;  %v3380_v59 = vld [vmem:[%s4844_s1 + $0x3cc] ss:$16 sps:$4 sm:$0xff]  }
  0x6f   :  { %1713 = vmatpush2.bf16.msra.mxu0 %v3291_v60  ;;  %v3375_v60 = vld [vmem:[%s4844_s1 + $0x1c8] ss:$16 sps:$4 sm:$0xff]  }
  0x70   :  { %1754 = vmatpush2.bf16.msra.mxu1 %v3294_v61  ;;  %1714 = vmatprep.subr.bf16.mxu0 %v3299_v62  ;;  %v3378_v61 = vld [vmem:[%s4844_s1 + $0x3c8] ss:$16 sps:$4 sm:$0xff]   ;;  %v3383_v62 = vld [vmem:[%s4844_s1 + $0x1ac] ss:$16 sps:$4 sm:$0xff]  }
  0x71   :  { %1755 = vmatprep.subr.bf16.mxu1 %v3302_v63  ;;  %v3386_v63 = vld [vmem:[%s4844_s1 + $0x3ac] ss:$16 sps:$4 sm:$0xff]  }
  0x73   :  { %1715 = vmatpush2.bf16.msra.mxu0 %v3297_v0  ;;  %v3381_v0 = vld [vmem:[%s4844_s1 + $0x1a8] ss:$16 sps:$4 sm:$0xff]  }
  0x74   :  { %1756 = vmatpush2.bf16.msra.mxu1 %v3300_v1  ;;  %1716 = vmatprep.subr.bf16.mxu0 %v3305_v2  ;;  %v3384_v1 = vld [vmem:[%s4844_s1 + $0x3a8] ss:$16 sps:$4 sm:$0xff]   ;;  %v3389_v2 = vld [vmem:[%s4844_s1 + $0x18c] ss:$16 sps:$4 sm:$0xff]  }
  0x75   :  { %1757 = vmatprep.subr.bf16.mxu1 %v3308_v3  ;;  %v3392_v3 = vld [vmem:[%s4844_s1 + $0x38c] ss:$16 sps:$4 sm:$0xff]  }
  0x77   :  { %1717 = vmatpush2.bf16.msra.mxu0 %v3303_v4  ;;  %v3387_v4 = vld [vmem:[%s4844_s1 + $0x188] ss:$16 sps:$4 sm:$0xff]  }
  0x78   :  { %1758 = vmatpush2.bf16.msra.mxu1 %v3306_v5  ;;  %1718 = vmatprep.subr.bf16.mxu0 %v3311_v6  ;;  %v3390_v5 = vld [vmem:[%s4844_s1 + $0x388] ss:$16 sps:$4 sm:$0xff]   ;;  %v3395_v6 = vld [vmem:[%s4844_s1 + $0x16c] ss:$16 sps:$4 sm:$0xff]  }
  0x79   :  { %1759 = vmatprep.subr.bf16.mxu1 %v3314_v7  ;;  %v3398_v7 = vld [vmem:[%s4844_s1 + $0x36c] ss:$16 sps:$4 sm:$0xff]  }
  0x7b   :  { %1719 = vmatpush2.bf16.msra.mxu0 %v3309_v10  ;;  %v3393_v10 = vld [vmem:[%s4844_s1 + $0x168] ss:$16 sps:$4 sm:$0xff]  }
  0x7c   :  { %1760 = vmatpush2.bf16.msra.mxu1 %v3312_v11  ;;  %1720 = vmatprep.subr.bf16.mxu0 %v3317_v12  ;;  %v3396_v11 = vld [vmem:[%s4844_s1 + $0x368] ss:$16 sps:$4 sm:$0xff]   ;;  %v3401_v12 = vld [vmem:[%s4844_s1 + $0x14c] ss:$16 sps:$4 sm:$0xff]  }
  0x7d   :  { %1761 = vmatprep.subr.bf16.mxu1 %v3320_v13  ;;  %v3404_v13 = vld [vmem:[%s4844_s1 + $0x34c] ss:$16 sps:$4 sm:$0xff]  }
  0x7f   :  { %1721 = vmatpush2.bf16.msra.mxu0 %v3315_v14  ;;  %v3399_v14 = vld [vmem:[%s4844_s1 + $0x148] ss:$16 sps:$4 sm:$0xff]  }
  0x80   :  { %1762 = vmatpush2.bf16.msra.mxu1 %v3318_v15  ;;  %1772 = vmatprep.subr.bf16.mxu0 %v3323_v18  ;;  %v3402_v15 = vld [vmem:[%s4844_s1 + $0x348] ss:$16 sps:$4 sm:$0xff]  }
  0x81   :  { %1813 = vmatprep.subr.bf16.mxu1 %v3326_v19  ;;  %v3405_v18 = vld [vmem:[%s4844_s1 + $0x128] ss:$16 sps:$4 sm:$0xff]  }
  0x82   :  { %1723 = vmatmul.mubr.bf16.vlgmr.msra.gmra.mxu0 %v4140_v20  ;;  %v3408_v19 = vld [vmem:[%s4844_s1 + $0x328] ss:$16 sps:$4 sm:$0xff]  }
  0x83   :  { %1764 = vmatmul.mubr.bf16.vlgmr.msra.gmra.mxu1 %v4142_v21  ;;  %1773 = vmatpush1.bf16.msra.mxu0 %v3321_v22  ;;  %v3413_v22 = vld [vmem:[%s4844_s1 + $0x10c] ss:$16 sps:$4 sm:$0xff]  }
  0x84   :  { %1814 = vmatpush1.bf16.msra.mxu1 %v3324_v23  ;;  %1774 = vmatprep.subr.bf16.mxu0 %v3329_v24  ;;  %v3416_v23 = vld [vmem:[%s4844_s1 + $0x30c] ss:$16 sps:$4 sm:$0xff]   ;;  %v3411_v24 = vld [vmem:[%s4844_s1 + $0x108] ss:$16 sps:$4 sm:$0xff]  }
  0x85   :  { %1815 = vmatprep.subr.bf16.mxu1 %v3332_v25  ;;  %1804 = vmatprep.mubr.bf16.mxu0 %v3855_v49  ;;  %v3344_v49 = vld [vmem:[%s4844_s1 + $0x28c] ss:$16 sps:$4 sm:$0xff]   ;;  %v3414_v25 = vld [vmem:[%s4844_s1 + $0x308] ss:$16 sps:$4 sm:$0xff]  }
  0x86   :  { %1845 = vmatprep.mubr.bf16.mxu1 %v3863_v52  ;;  %v3339_v52 = vld [vmem:[%s4844_s1 + $0x88] ss:$16 sps:$4 sm:$0xff]  }
  0x87   :  { %1775 = vmatpush1.bf16.msra.mxu0 %v3327_v26  ;;  %v3419_v26 = vld [vmem:[%s4844_s1 + $0x4ec] ss:$16 sps:$4 sm:$0xff]  }
  0x88   :  { %1816 = vmatpush1.bf16.msra.mxu1 %v3330_v27  ;;  %1776 = vmatprep.subr.bf16.mxu0 %v3335_v28  ;;  %v3422_v27 = vld [vmem:[%s4844_s1 + $0x6ec] ss:$16 sps:$4 sm:$0xff]   ;;  %v3417_v28 = vld [vmem:[%s4844_s1 + $0x4e8] ss:$16 sps:$4 sm:$0xff]  }
  0x89   :  { %1817 = vmatprep.subr.bf16.mxu1 %v3338_v29  ;;  %v3420_v29 = vld [vmem:[%s4844_s1 + $0x6e8] ss:$16 sps:$4 sm:$0xff]  }
  0x8b   :  { %1777 = vmatpush1.bf16.msra.mxu0 %v3333_v30  ;;  %v3425_v30 = vld [vmem:[%s4844_s1 + $0x4cc] ss:$16 sps:$4 sm:$0xff]  }
  0x8c   :  { %1818 = vmatpush1.bf16.msra.mxu1 %v3336_v31  ;;  %1778 = vmatprep.subr.bf16.mxu0 %v3341_v32  ;;  %v3428_v31 = vld [vmem:[%s4844_s1 + $0x6cc] ss:$16 sps:$4 sm:$0xff]   ;;  %v3423_v32 = vld [vmem:[%s4844_s1 + $0x4c8] ss:$16 sps:$4 sm:$0xff]  }
  0x8d   :  { %1819 = vmatprep.subr.bf16.mxu1 %v3344_v49  ;;  %v3426_v49 = vld [vmem:[%s4844_s1 + $0x6c8] ss:$16 sps:$4 sm:$0xff]  }
  0x8f   :  { %1779 = vmatpush1.bf16.msra.mxu0 %v3339_v52  ;;  %v3431_v52 = vld [vmem:[%s4844_s1 + $0x4ac] ss:$16 sps:$4 sm:$0xff]  }
  0x90   :  { %1820 = vmatpush1.bf16.msra.mxu1 %v3342_v33  ;;  %1780 = vmatprep.subr.bf16.mxu0 %v3347_v34  ;;  %v3434_v33 = vld [vmem:[%s4844_s1 + $0x6ac] ss:$16 sps:$4 sm:$0xff]   ;;  %v3429_v34 = vld [vmem:[%s4844_s1 + $0x4a8] ss:$16 sps:$4 sm:$0xff]  }
  0x91   :  { %1821 = vmatprep.subr.bf16.mxu1 %v3350_v35  ;;  %v3440_v35 = vld [vmem:[%s4844_s1 + $0x68c] ss:$16 sps:$4 sm:$0xff]  }
  0x93   :  { %1781 = vmatpush1.bf16.msra.mxu0 %v3345_v36  ;;  %v3435_v36 = vld [vmem:[%s4844_s1 + $0x488] ss:$16 sps:$4 sm:$0xff]  }
  0x94   :  { %1822 = vmatpush1.bf16.msra.mxu1 %v3348_v38  ;;  %1782 = vmatprep.subr.bf16.mxu0 %v3353_v39  ;;  %v3446_v38 = vld [vmem:[%s4844_s1 + $0x66c] ss:$16 sps:$4 sm:$0xff]   ;;  %v3441_v39 = vld [vmem:[%s4844_s1 + $0x468] ss:$16 sps:$4 sm:$0xff]  }
  0x95   :  { %1823 = vmatprep.subr.bf16.mxu1 %v3356_v41  ;;  %v3444_v41 = vld [vmem:[%s4844_s1 + $0x668] ss:$16 sps:$4 sm:$0xff]  }
  0x97   :  { %1783 = vmatpush1.bf16.msra.mxu0 %v3351_v42  ;;  %v3449_v42 = vld [vmem:[%s4844_s1 + $0x44c] ss:$16 sps:$4 sm:$0xff]  }
  0x98   :  { %1824 = vmatpush1.bf16.msra.mxu1 %v3354_v43  ;;  %1784 = vmatprep.subr.bf16.mxu0 %v3359_v44  ;;  %v3452_v43 = vld [vmem:[%s4844_s1 + $0x64c] ss:$16 sps:$4 sm:$0xff]   ;;  %v3447_v44 = vld [vmem:[%s4844_s1 + $0x448] ss:$16 sps:$4 sm:$0xff]  }
  0x99   :  { %1825 = vmatprep.subr.bf16.mxu1 %v3362_v45  ;;  %v3450_v45 = vld [vmem:[%s4844_s1 + $0x648] ss:$16 sps:$4 sm:$0xff]  }
  0x9b   :  { %1785 = vmatpush1.bf16.msra.mxu0 %v3357_v46  ;;  %v3455_v46 = vld [vmem:[%s4844_s1 + $0x42c] ss:$16 sps:$4 sm:$0xff]  }
  0x9c   :  { %1826 = vmatpush1.bf16.msra.mxu1 %v3360_v47  ;;  %1786 = vmatprep.subr.bf16.mxu0 %v3365_v48  ;;  %v3458_v47 = vld [vmem:[%s4844_s1 + $0x62c] ss:$16 sps:$4 sm:$0xff]   ;;  %v3453_v48 = vld [vmem:[%s4844_s1 + $0x428] ss:$16 sps:$4 sm:$0xff]  }
  0x9d   :  { %1827 = vmatprep.subr.bf16.mxu1 %v3368_v50  ;;  %v3456_v50 = vld [vmem:[%s4844_s1 + $0x628] ss:$16 sps:$4 sm:$0xff]  }
  0x9f   :  { %1787 = vmatpush1.bf16.msra.mxu0 %v3363_v51  ;;  %v3461_v51 = vld [vmem:[%s4844_s1 + $0x40c] ss:$16 sps:$4 sm:$0xff]  }
  0xa0   :  { %1828 = vmatpush1.bf16.msra.mxu1 %v3366_v53  ;;  %1788 = vmatprep.subr.bf16.mxu0 %v3371_v54  ;;  %v3464_v53 = vld [vmem:[%s4844_s1 + $0x60c] ss:$16 sps:$4 sm:$0xff]   ;;  %v3459_v54 = vld [vmem:[%s4844_s1 + $0x408] ss:$16 sps:$4 sm:$0xff]  }
  0xa1   :  { %1829 = vmatprep.subr.bf16.mxu1 %v3374_v55  ;;  %v3462_v55 = vld [vmem:[%s4844_s1 + $0x608] ss:$16 sps:$4 sm:$0xff]  }
  0xa3   :  { %1789 = vmatpush2.bf16.msra.mxu0 %v3369_v56  ;;  %v3467_v56 = vld [vmem:[%s4844_s1 + $0x5ec] ss:$16 sps:$4 sm:$0xff]  }
  0xa4   :  { %1830 = vmatpush2.bf16.msra.mxu1 %v3372_v57  ;;  %1790 = vmatprep.subr.bf16.mxu0 %v3377_v58  ;;  %v3470_v57 = vld [vmem:[%s4844_s1 + $0x7ec] ss:$16 sps:$4 sm:$0xff]  }
  0xa5   :  { %1831 = vmatprep.subr.bf16.mxu1 %v3380_v59 }
  0xa7   :  { %1791 = vmatpush2.bf16.msra.mxu0 %v3375_v60 }
  0xa8   :  { %1832 = vmatpush2.bf16.msra.mxu1 %v3378_v61  ;;  %1792 = vmatprep.subr.bf16.mxu0 %v3383_v62 }
  0xa9   :  { %1833 = vmatprep.subr.bf16.mxu1 %v3386_v63 }
  0xab   :  { %1793 = vmatpush2.bf16.msra.mxu0 %v3381_v0 }
  0xac   :  { %1834 = vmatpush2.bf16.msra.mxu1 %v3384_v1  ;;  %1794 = vmatprep.subr.bf16.mxu0 %v3389_v2 }
  0xad   :  { %1835 = vmatprep.subr.bf16.mxu1 %v3392_v3 }
  0xaf   :  { %1795 = vmatpush2.bf16.msra.mxu0 %v3387_v4 }
  0xb0   :  { %1836 = vmatpush2.bf16.msra.mxu1 %v3390_v5  ;;  %1796 = vmatprep.subr.bf16.mxu0 %v3395_v6 }
  0xb1   :  { %1837 = vmatprep.subr.bf16.mxu1 %v3398_v7 }
  0xb3   :  { %1797 = vmatpush2.bf16.msra.mxu0 %v3393_v10 }
  0xb4   :  { %1838 = vmatpush2.bf16.msra.mxu1 %v3396_v11  ;;  %1798 = vmatprep.subr.bf16.mxu0 %v3401_v12 }
  0xb5   :  { %1839 = vmatprep.subr.bf16.mxu1 %v3404_v13 }
  0xb7   :  { %1799 = vmatpush2.bf16.msra.mxu0 %v3399_v14 }
  0xb8   :  { %1840 = vmatpush2.bf16.msra.mxu1 %v3402_v15  ;;  %1800 = vmatprep.subr.bf16.mxu0 %v3407_v16 }
  0xb9   :  { %1841 = vmatprep.subr.bf16.mxu1 %v3410_v17 }
  0xbb   :  { %1801 = vmatpush2.bf16.msra.mxu0 %v3405_v18 }
  0xbc   :  { %1842 = vmatpush2.bf16.msra.mxu1 %v3408_v19  ;;  %1802 = vmatprep.subr.bf16.mxu0 %v3413_v22 }
  0xbd   :  { %1843 = vmatprep.subr.bf16.mxu1 %v3416_v23 }
  0xbf   :  { %1803 = vmatpush2.bf16.msra.mxu0 %v3411_v24 }
  0xc0   :  { %1844 = vmatpush2.bf16.msra.mxu1 %v3414_v25  ;;  %1854 = vmatprep.subr.bf16.mxu0 %v3419_v26 }
  0xc1   :  { %1895 = vmatprep.subr.bf16.mxu1 %v3422_v27 }
  0xc2   :  { %1805 = vmatmul.mubr.bf16.vlgmr.msra.gmra.mxu0 %v3924_v8  ;;  %v3432_v8 = vld [vmem:[%s4844_s1 + $0x6a8] ss:$16 sps:$4 sm:$0xff]  }
  0xc3   :  { %1846 = vmatmul.mubr.bf16.vlgmr.msra.gmra.mxu1 %v3926_v9  ;;  %1855 = vmatpush1.bf16.msra.mxu0 %v3417_v28  ;;  %v3437_v9 = vld [vmem:[%s4844_s1 + $0x48c] ss:$16 sps:$4 sm:$0xff]  }
  0xc4   :  { %1896 = vmatpush1.bf16.msra.mxu1 %v3420_v29  ;;  %1856 = vmatprep.subr.bf16.mxu0 %v3425_v30 }
  0xc5   :  { %1897 = vmatprep.subr.bf16.mxu1 %v3428_v31  ;;  %1886 = vmatprep.mubr.bf16.mxu0 %v4011_v37  ;;  %v3438_v37 = vld [vmem:[%s4844_s1 + $0x688] ss:$16 sps:$4 sm:$0xff]  }
  0xc6   :  { %1927 = vmatprep.mubr.bf16.mxu1 %v4019_v40  ;;  %v3443_v40 = vld [vmem:[%s4844_s1 + $0x46c] ss:$16 sps:$4 sm:$0xff]  }
  0xc7   :  { %1857 = vmatpush1.bf16.msra.mxu0 %v3423_v32 }
  0xc8   :  { %1898 = vmatpush1.bf16.msra.mxu1 %v3426_v49  ;;  %1858 = vmatprep.subr.bf16.mxu0 %v3431_v52 }
  0xc9   :  { %1899 = vmatprep.subr.bf16.mxu1 %v3434_v33 }
  0xcb   :  { %1859 = vmatpush1.bf16.msra.mxu0 %v3429_v34 }
  0xcc   :  { %1900 = vmatpush1.bf16.msra.mxu1 %v3432_v8  ;;  %1860 = vmatprep.subr.bf16.mxu0 %v3437_v9 }
  0xcd   :  { %1901 = vmatprep.subr.bf16.mxu1 %v3440_v35 }
  0xcf   :  { %1861 = vmatpush1.bf16.msra.mxu0 %v3435_v36 }
  0xd0   :  { %1902 = vmatpush1.bf16.msra.mxu1 %v3438_v37  ;;  %1862 = vmatprep.subr.bf16.mxu0 %v3443_v40 }
  0xd1   :  { %1903 = vmatprep.subr.bf16.mxu1 %v3446_v38 }
  0xd3   :  { %1863 = vmatpush1.bf16.msra.mxu0 %v3441_v39 }
  0xd4   :  { %1904 = vmatpush1.bf16.msra.mxu1 %v3444_v41  ;;  %1864 = vmatprep.subr.bf16.mxu0 %v3449_v42 }
  0xd5   :  { %1905 = vmatprep.subr.bf16.mxu1 %v3452_v43 }
  0xd7   :  { %1865 = vmatpush1.bf16.msra.mxu0 %v3447_v44 }
  0xd8   :  { %1906 = vmatpush1.bf16.msra.mxu1 %v3450_v45  ;;  %1866 = vmatprep.subr.bf16.mxu0 %v3455_v46 }
  0xd9   :  { %1907 = vmatprep.subr.bf16.mxu1 %v3458_v47 }
  0xdb   :  { %1867 = vmatpush1.bf16.msra.mxu0 %v3453_v48 }
  0xdc   :  { %1908 = vmatpush1.bf16.msra.mxu1 %v3456_v50  ;;  %1868 = vmatprep.subr.bf16.mxu0 %v3461_v51 }
  0xdd   :  { %1909 = vmatprep.subr.bf16.mxu1 %v3464_v53 }
  0xde   :  { %14 = vsyncpa [#allocation3], 0  ;;  %v3465_v58 = vld [vmem:[%s4844_s1 + $0x5e8] ss:$16 sps:$4 sm:$0xff]   ;;  %v3473_v60 = vld [vmem:[%s4844_s1 + $0x5cc] ss:$16 sps:$4 sm:$0xff]  }
  0xdf   :  { %1869 = vmatpush1.bf16.msra.mxu0 %v3459_v54  ;;  %v3468_v59 = vld [vmem:[%s4844_s1 + $0x7e8] ss:$16 sps:$4 sm:$0xff]   ;;  %v3476_v61 = vld [vmem:[%s4844_s1 + $0x7cc] ss:$16 sps:$4 sm:$0xff]   ;;  %vm3656_vm0 = vmmov 0  }
  0xe0   :  { %1910 = vmatpush1.bf16.msra.mxu1 %v3462_v55  ;;  %1870 = vmatprep.subr.bf16.mxu0 %v3467_v56  ;;  %v3471_v62 = vld [vmem:[%s4844_s1 + $0x5c8] ss:$16 sps:$4 sm:$0xff]   ;;  %v3479_v0 = vld [vmem:[%s4844_s1 + $0x5ac] ss:$16 sps:$4 sm:$0xff]  }
  0xe1   :  { %1911 = vmatprep.subr.bf16.mxu1 %v3470_v57  ;;  %v3474_v63 = vld [vmem:[%s4844_s1 + $0x7c8] ss:$16 sps:$4 sm:$0xff]   ;;  %v3482_v1 = vld [vmem:[%s4844_s1 + $0x7ac] ss:$16 sps:$4 sm:$0xff]  }
  0xe2   :  { %v3477_v2 = vld [vmem:[%s4844_s1 + $0x5a8] ss:$16 sps:$4 sm:$0xff]   ;;  %v3485_v4 = vld [vmem:[%s4844_s1 + $0x58c] ss:$16 sps:$4 sm:$0xff]  }
  0xe3   :  { %1871 = vmatpush2.bf16.msra.mxu0 %v3465_v58  ;;  %v3480_v3 = vld [vmem:[%s4844_s1 + $0x7a8] ss:$16 sps:$4 sm:$0xff]   ;;  %v3488_v5 = vld [vmem:[%s4844_s1 + $0x78c] ss:$16 sps:$4 sm:$0xff]  }
  0xe4   :  { %1912 = vmatpush2.bf16.msra.mxu1 %v3468_v59  ;;  %1872 = vmatprep.subr.bf16.mxu0 %v3473_v60  ;;  %v3483_v6 = vld [vmem:[%s4844_s1 + $0x588] ss:$16 sps:$4 sm:$0xff]   ;;  %v3491_v10 = vld [vmem:[%s4844_s1 + $0x56c] ss:$16 sps:$4 sm:$0xff]  }
  0xe5   :  { %1913 = vmatprep.subr.bf16.mxu1 %v3476_v61  ;;  %v3486_v7 = vld [vmem:[%s4844_s1 + $0x788] ss:$16 sps:$4 sm:$0xff]   ;;  %v3494_v11 = vld [vmem:[%s4844_s1 + $0x76c] ss:$16 sps:$4 sm:$0xff]  }
  0xe6   :  { %v3489_v12 = vld [vmem:[%s4844_s1 + $0x568] ss:$16 sps:$4 sm:$0xff]   ;;  %v3497_v14 = vld [vmem:[%s4844_s1 + $0x54c] ss:$16 sps:$4 sm:$0xff]  }
  0xe7   :  { %1873 = vmatpush2.bf16.msra.mxu0 %v3471_v62  ;;  %v3492_v13 = vld [vmem:[%s4844_s1 + $0x768] ss:$16 sps:$4 sm:$0xff]   ;;  %v3500_v15 = vld [vmem:[%s4844_s1 + $0x74c] ss:$16 sps:$4 sm:$0xff]  }
  0xe8   :  { %1914 = vmatpush2.bf16.msra.mxu1 %v3474_v63  ;;  %1874 = vmatprep.subr.bf16.mxu0 %v3479_v0  ;;  %v3495_v16 = vld [vmem:[%s4844_s1 + $0x548] ss:$16 sps:$4 sm:$0xff]   ;;  %v3503_v18 = vld [vmem:[%s4844_s1 + $0x52c] ss:$16 sps:$4 sm:$0xff]  }
  0xe9   :  { %1915 = vmatprep.subr.bf16.mxu1 %v3482_v1  ;;  %v3498_v17 = vld [vmem:[%s4844_s1 + $0x748] ss:$16 sps:$4 sm:$0xff]   ;;  %v3506_v19 = vld [vmem:[%s4844_s1 + $0x72c] ss:$16 sps:$4 sm:$0xff]  }
  0xea   :  { %v3501_v22 = vld [vmem:[%s4844_s1 + $0x528] ss:$16 sps:$4 sm:$0xff]   ;;  %v3509_v24 = vld [vmem:[%s4844_s1 + $0x50c] ss:$16 sps:$4 sm:$0xff]  }
  0xeb   :  { %1875 = vmatpush2.bf16.msra.mxu0 %v3477_v2  ;;  %v3504_v23 = vld [vmem:[%s4844_s1 + $0x728] ss:$16 sps:$4 sm:$0xff]   ;;  %v3512_v25 = vld [vmem:[%s4844_s1 + $0x70c] ss:$16 sps:$4 sm:$0xff]  }
  0xec   :  { %1916 = vmatpush2.bf16.msra.mxu1 %v3480_v3  ;;  %1876 = vmatprep.subr.bf16.mxu0 %v3485_v4  ;;  %v3507_v26 = vld [vmem:[%s4844_s1 + $0x508] ss:$16 sps:$4 sm:$0xff]   ;;  %v3515_v28 = vld [vmem:[%s4846_s3 + $0x74] ss:$8 sps:$4 sm:$0xff]   ;;  %v3518_v30 = vld [vmem:[%s4846_s3 + $0x64] ss:$8 sps:$4 sm:$0xff]  }
  0xed   :  { %1917 = vmatprep.subr.bf16.mxu1 %v3488_v5  ;;  %v3510_v27 = vld [vmem:[%s4844_s1 + $0x708] ss:$16 sps:$4 sm:$0xff]   ;;  %v3521_v34 = vld [vmem:[%s4846_s3 + $0x54] ss:$8 sps:$4 sm:$0xff]   ;;  %v3524_v36 = vld [vmem:[%s4846_s3 + $0x44] ss:$8 sps:$4 sm:$0xff]  }
  0xee   :  { %v3513_v29 = vld [vmem:[%s4846_s3 + $0x70] ss:$8 sps:$4 sm:$0xff]   ;;  %v3516_v49 = vld [vmem:[%s4846_s3 + $0x60] ss:$8 sps:$4 sm:$0xff]   ;;  %v3563_v40 = vld [vmem:[%s4846_s3 + $0x174] ss:$8 sps:$4 sm:$0xff]  }
  0xef   :  { %1877 = vmatpush2.bf16.msra.mxu0 %v3483_v6  ;;  %v3561_v37 = vld [vmem:[%s4846_s3 + $0x170] ss:$8 sps:$4 sm:$0xff]   ;;  %v3566_v38 = vld [vmem:[%s4846_s3 + $0x164] ss:$8 sps:$4 sm:$0xff]   ;;  %v3522_v39 = vld [vmem:[%s4846_s3 + $0x40] ss:$8 sps:$4 sm:$0xff]  }
  0xf0   :  { %1918 = vmatpush2.bf16.msra.mxu1 %v3486_v7  ;;  %1878 = vmatprep.subr.bf16.mxu0 %v3491_v10  ;;  %v3564_v41 = vld [vmem:[%s4846_s3 + $0x160] ss:$8 sps:$4 sm:$0xff]   ;;  %v3527_v42 = vld [vmem:[%s4846_s3 + $0x34] ss:$8 sps:$4 sm:$0xff]   ;;  %v3525_v44 = vld [vmem:[%s4846_s3 + $0x30] ss:$8 sps:$4 sm:$0xff]  }
  0xf1   :  { %1919 = vmatprep.subr.bf16.mxu1 %v3494_v11  ;;  %v3569_v43 = vld [vmem:[%s4846_s3 + $0x154] ss:$8 sps:$4 sm:$0xff]   ;;  %v3567_v45 = vld [vmem:[%s4846_s3 + $0x150] ss:$8 sps:$4 sm:$0xff]   ;;  %v3530_v46 = vld [vmem:[%s4846_s3 + $0x24] ss:$8 sps:$4 sm:$0xff]  }
  0xf2   :  { %v3572_v47 = vld [vmem:[%s4846_s3 + $0x144] ss:$8 sps:$4 sm:$0xff]   ;;  %v3528_v48 = vld [vmem:[%s4846_s3 + $0x20] ss:$8 sps:$4 sm:$0xff]   ;;  %v3533_v51 = vld [vmem:[%s4846_s3 + $0x14] ss:$8 sps:$4 sm:$0xff]  }
  0xf3   :  { %1879 = vmatpush2.bf16.msra.mxu0 %v3489_v12  ;;  %v3570_v50 = vld [vmem:[%s4846_s3 + $0x140] ss:$8 sps:$4 sm:$0xff]   ;;  %v3575_v53 = vld [vmem:[%s4846_s3 + $0x134] ss:$8 sps:$4 sm:$0xff]   ;;  %v3531_v54 = vld [vmem:[%s4846_s3 + $0x10] ss:$8 sps:$4 sm:$0xff]  }
  0xf4   :  { %1920 = vmatpush2.bf16.msra.mxu1 %v3492_v13  ;;  %1880 = vmatprep.subr.bf16.mxu0 %v3497_v14  ;;  %v3573_v55 = vld [vmem:[%s4846_s3 + $0x130] ss:$8 sps:$4 sm:$0xff]   ;;  %v3536_v56 = vld [vmem:[%s4846_s3 + $0x4] ss:$8 sps:$4 sm:$0xff]   ;;  %v3534_v58 = vld [vmem:[%s4846_s3] ss:$8 sps:$4 sm:$0xff]  }
  0xf5   :  { %1921 = vmatprep.subr.bf16.mxu1 %v3500_v15  ;;  %v3578_v57 = vld [vmem:[%s4846_s3 + $0x124] ss:$8 sps:$4 sm:$0xff]   ;;  %v3576_v59 = vld [vmem:[%s4846_s3 + $0x120] ss:$8 sps:$4 sm:$0xff]   ;;  %v3539_v60 = vld [vmem:[%s4846_s3 + $0xf4] ss:$8 sps:$4 sm:$0xff]  }
  0xf6   :  { %v3581_v61 = vld [vmem:[%s4846_s3 + $0x114] ss:$8 sps:$4 sm:$0xff]   ;;  %v3537_v62 = vld [vmem:[%s4846_s3 + $0xf0] ss:$8 sps:$4 sm:$0xff]   ;;  %v3542_v0 = vld [vmem:[%s4846_s3 + $0xe4] ss:$8 sps:$4 sm:$0xff]  }
  0xf7   :  { %1881 = vmatpush2.bf16.msra.mxu0 %v3495_v16  ;;  %v3579_v63 = vld [vmem:[%s4846_s3 + $0x110] ss:$8 sps:$4 sm:$0xff]   ;;  %v3584_v1 = vld [vmem:[%s4846_s3 + $0x104] ss:$8 sps:$4 sm:$0xff]   ;;  %v3540_v2 = vld [vmem:[%s4846_s3 + $0xe0] ss:$8 sps:$4 sm:$0xff]   ;;  %v308_v16 = vlaneseq }
  0xf8   :  { %1922 = vmatpush2.bf16.msra.mxu1 %v3498_v17  ;;  %1882 = vmatprep.subr.bf16.mxu0 %v3503_v18  ;;  %v3582_v3 = vld [vmem:[%s4846_s3 + $0x100] ss:$8 sps:$4 sm:$0xff]   ;;  %v3545_v4 = vld [vmem:[%s4846_s3 + $0xd4] ss:$8 sps:$4 sm:$0xff]   ;;  %v3543_v6 = vld [vmem:[%s4846_s3 + $0xd0] ss:$8 sps:$4 sm:$0xff]  }
  0xf9   :  { %1923 = vmatprep.subr.bf16.mxu1 %v3506_v19  ;;  %v3587_v5 = vld [vmem:[%s4846_s3 + $0x1f4] ss:$8 sps:$4 sm:$0xff]   ;;  %v3585_v7 = vld [vmem:[%s4846_s3 + $0x1f0] ss:$8 sps:$4 sm:$0xff]   ;;  %v3548_v10 = vld [vmem:[%s4846_s3 + $0xc4] ss:$8 sps:$4 sm:$0xff]  }
  0xfa   :  { %v3590_v11 = vld [vmem:[%s4846_s3 + $0x1e4] ss:$8 sps:$4 sm:$0xff]   ;;  %v3546_v12 = vld [vmem:[%s4846_s3 + $0xc0] ss:$8 sps:$4 sm:$0xff]   ;;  %v3551_v14 = vld [vmem:[%s4846_s3 + $0xb4] ss:$8 sps:$4 sm:$0xff]  }
  0xfb   :  { %1883 = vmatpush2.bf16.msra.mxu0 %v3501_v22  ;;  %v3588_v13 = vld [vmem:[%s4846_s3 + $0x1e0] ss:$8 sps:$4 sm:$0xff]   ;;  %v3593_v15 = vld [vmem:[%s4846_s3 + $0x1d4] ss:$8 sps:$4 sm:$0xff]   ;;  %v3549_v17 = vld [vmem:[%s4846_s3 + $0xb0] ss:$8 sps:$4 sm:$0xff]  }
  0xfc   :  { %1924 = vmatpush2.bf16.msra.mxu1 %v3504_v23  ;;  %1884 = vmatprep.subr.bf16.mxu0 %v3509_v24  ;;  %v3591_v18 = vld [vmem:[%s4846_s3 + $0x1d0] ss:$8 sps:$4 sm:$0xff]   ;;  %v3554_v19 = vld [vmem:[%s4846_s3 + $0xa4] ss:$8 sps:$4 sm:$0xff]   ;;  %v4690_v23 = vshrl.u32 %v308_v16, 7 }
  0xfd   :  { %1925 = vmatprep.subr.bf16.mxu1 %v3512_v25  ;;  %v3596_v22 = vld [vmem:[%s4846_s3 + $0x1c4] ss:$8 sps:$4 sm:$0xff]   ;;  %v3552_v24 = vld [vmem:[%s4846_s3 + $0xa0] ss:$8 sps:$4 sm:$0xff]   ;;  %v3620_v16 = vld [vmem:[%s4848_s5 + $0x10] sm:$0xff]  }
  0xfe   :  { %v3594_v25 = vld [vmem:[%s4846_s3 + $0x1c0] ss:$8 sps:$4 sm:$0xff]  }
  0xff   :  { %1885 = vmatpush2.bf16.msra.mxu0 %v3507_v26  ;;  %v3557_v26 = vld [vmem:[%s4846_s3 + $0x94] ss:$8 sps:$4 sm:$0xff]  }
 0x100   :  { %1926 = vmatpush2.bf16.msra.mxu1 %v3510_v27  ;;  %2340 = vmatprep.subr.bf16.mxu0 %v3515_v28  ;;  %v3599_v27 = vld [vmem:[%s4846_s3 + $0x1b4] ss:$8 sps:$4 sm:$0xff]   ;;  %v310_v28 = vsub.s32 0, %v4690_v23 }
 0x101   :  { %2381 = vmatprep.subr.bf16.mxu1 %v3563_v40 }
 0x102   :  { %v4539_v31 = vpop.f32.mrf.mxu0  ;;  %1887 = vmatmul.mubr.bf16.vlgmr.msra.gmra.mxu0 %v4140_v20  ;;  %v3519_v20 = vld [vmem:[%s4846_s3 + $0x50] ss:$8 sps:$4 sm:$0xff]  }
 0x103   :  { %v4541_v32 = vpop.f32.mrf.mxu1  ;;  %1928 = vmatmul.mubr.bf16.vlgmr.msra.gmra.mxu1 %v4142_v21  ;;  %2341 = vmatpush1.bf16.msra.mxu0 %v3513_v29  ;;  %v4708_v29 = vld [vmem:[%s4845_s2] sm:$0xf] }
 0x104   :  { %v4548_v52 = vpop.f32.mrf.mxu0  ;;  %2342 = vmatprep.subr.bf16.mxu0 %v3518_v30  ;;  %2382 = vmatpush1.bf16.msra.mxu1 %v3561_v37  ;;  %v314_v30 = vsub.s32 1, %v4690_v23  ;;  %v3602_v37 = vld [vmem:[%s4846_s3 + $0x1a4] ss:$8 sps:$4 sm:$0xff]  }
 0x105   :  { %v4550_v33 = vpop.f32.mrf.mxu1  ;;  %2383 = vmatprep.subr.bf16.mxu1 %v3566_v38  ;;  %v3600_v38 = vld [vmem:[%s4846_s3 + $0x1a0] ss:$8 sps:$4 sm:$0xff]  }
 0x106   :  { %v1646_v8 = vpop.f32.mrf.mxu0 }
 0x107   :  { %v1687_v9 = vpop.f32.mrf.mxu1  ;;  %2343 = vmatpush1.bf16.msra.mxu0 %v3516_v49  ;;  %v3555_v49 = vld [vmem:[%s4846_s3 + $0x90] ss:$8 sps:$4 sm:$0xff]   ;;  %v3560_v8 = vld [vmem:[%s4846_s3 + $0x84] ss:$8 sps:$4 sm:$0xff]  }
 0x108   :  { %v1647_v21 = vpop.f32.mrf.mxu0  ;;  %2344 = vmatprep.subr.bf16.mxu0 %v3521_v34  ;;  %2384 = vmatpush1.bf16.msra.mxu1 %v3564_v41  ;;  %v3597_v34 = vld [vmem:[%s4846_s3 + $0x1b0] ss:$8 sps:$4 sm:$0xff]   ;;  %v311_v9 = vrot.slane %v4708_v29, %v310_v28 }
 0x109   :  { %v1688_v35 = vpop.f32.mrf.mxu1  ;;  %2385 = vmatprep.subr.bf16.mxu1 %v3569_v43  ;;  %v3558_v21 = vld [vmem:[%s4846_s3 + $0x80] ss:$8 sps:$4 sm:$0xff]  }
 0x10a   :  { %v1643_v35 = vadd.f32 %v4539_v31, %v311_v9 }
 0x10b   :  { %2345 = vmatpush1.bf16.msra.mxu0 %v3519_v20  ;;  %v315_v20 = vrot.slane %v4708_v29, %v314_v30 }
 0x10c   :  { %2346 = vmatprep.subr.bf16.mxu0 %v3524_v36  ;;  %2386 = vmatpush1.bf16.msra.mxu1 %v3567_v45  ;;  %v1684_v40 = vadd.f32 %v4541_v32, %v1643_v35  ;;  %v3603_v32 = vld [vmem:[%s4846_s3 + $0x190] ss:$8 sps:$4 sm:$0xff]  }
 0x10d   :  { %2387 = vmatprep.subr.bf16.mxu1 %v3572_v47  ;;  %v1645_v36 = vadd.f32 %v4548_v52, %v315_v20 }
 0x10f   :  { %2347 = vmatpush1.bf16.msra.mxu0 %v3522_v39 }
 0x110   :  { %2348 = vmatprep.subr.bf16.mxu0 %v3527_v42  ;;  %2388 = vmatpush1.bf16.msra.mxu1 %v3570_v50  ;;  %v1686_v42 = vadd.f32 %v4550_v33, %v1645_v36 }
 0x111   :  { %2389 = vmatprep.subr.bf16.mxu1 %v3575_v53 }
 0x113   :  { %2349 = vmatpush1.bf16.msra.mxu0 %v3525_v44  ;;  %v3605_v44 = vld [vmem:[%s4846_s3 + $0x194] ss:$8 sps:$4 sm:$0xff]  }
 0x114   :  { %2350 = vmatprep.subr.bf16.mxu0 %v3530_v46  ;;  %2390 = vmatpush1.bf16.msra.mxu1 %v3573_v55 }
 0x115   :  { %2391 = vmatprep.subr.bf16.mxu1 %v3578_v57 }
 0x117   :  { %2351 = vmatpush1.bf16.msra.mxu0 %v3528_v48 }
 0x118   :  { %2352 = vmatprep.subr.bf16.mxu0 %v3533_v51  ;;  %2392 = vmatpush1.bf16.msra.mxu1 %v3576_v59 }
 0x119   :  { %2393 = vmatprep.subr.bf16.mxu1 %v3581_v61 }
 0x11b   :  { %2353 = vmatpush1.bf16.msra.mxu0 %v3531_v54  ;;  %v3608_v54 = vld [vmem:[%s4846_s3 + $0x184] ss:$8 sps:$4 sm:$0xff]  }
 0x11c   :  { %2354 = vmatprep.subr.bf16.mxu0 %v3536_v56  ;;  %2394 = vmatpush1.bf16.msra.mxu1 %v3579_v63  ;;  %v3606_v56 = vld [vmem:[%s4846_s3 + $0x180] ss:$8 sps:$4 sm:$0xff]  }
 0x11d   :  { %2395 = vmatprep.subr.bf16.mxu1 %v3584_v1 }
 0x11f   :  { %2355 = vmatpush1.bf16.msra.mxu0 %v3534_v58 }
 0x120   :  { %2356 = vmatprep.subr.bf16.mxu0 %v3539_v60  ;;  %2396 = vmatpush1.bf16.msra.mxu1 %v3582_v3  ;;  %v3609_v3 = vld [vmem:[%s4848_s5 + $0x78] sm:$0xff]  }
 0x121   :  { %2397 = vmatprep.subr.bf16.mxu1 %v3587_v5  ;;  %v3611_v5 = vld [vmem:[%s4848_s5 + $0x70] sm:$0xff]  }
 0x123   :  { %2357 = vmatpush2.bf16.msra.mxu0 %v3537_v62 }
 0x124   :  { %2358 = vmatprep.subr.bf16.mxu0 %v3542_v0  ;;  %2398 = vmatpush2.bf16.msra.mxu1 %v3585_v7  ;;  %v3613_v7 = vld [vmem:[%s4848_s5 + $0x68] sm:$0xff]  }
 0x125   :  { %2399 = vmatprep.subr.bf16.mxu1 %v3590_v11  ;;  %v3615_v11 = vld [vmem:[%s4848_s5 + $0x60] sm:$0xff]  }
 0x127   :  { %2359 = vmatpush2.bf16.msra.mxu0 %v3540_v2 }
 0x128   :  { %2360 = vmatprep.subr.bf16.mxu0 %v3545_v4  ;;  %2400 = vmatpush2.bf16.msra.mxu1 %v3588_v13  ;;  %v3610_v4 = vld [vmem:[%s4848_s5 + $0x38] sm:$0xff]  }
 0x129   :  { %2401 = vmatprep.subr.bf16.mxu1 %v3593_v15  ;;  %v3617_v13 = vld [vmem:[%s4848_s5 + $0x58] sm:$0xff]   ;;  %v3619_v15 = vld [vmem:[%s4848_s5 + $0x50] sm:$0xff]  }
 0x12b   :  { %2361 = vmatpush2.bf16.msra.mxu0 %v3543_v6  ;;  %v3612_v6 = vld [vmem:[%s4848_s5 + $0x30] sm:$0xff]  }
 0x12c   :  { %2362 = vmatprep.subr.bf16.mxu0 %v3548_v10  ;;  %2402 = vmatpush2.bf16.msra.mxu1 %v3591_v18  ;;  %v3614_v10 = vld [vmem:[%s4848_s5 + $0x28] sm:$0xff]   ;;  %v322_v18 = vsub.s32 3, %v4690_v23 }
 0x12d   :  { %2403 = vmatprep.subr.bf16.mxu1 %v3596_v22 }
 0x12e   :  { %v323_v22 = vrot.slane %v4708_v29, %v322_v18  ;;  %v3066_v18 = vld [vmem:[%s4851_s8] ss:$0 sm:$0xff] }
 0x12f   :  { %2363 = vmatpush2.bf16.msra.mxu0 %v3546_v12  ;;  %v3616_v12 = vld [vmem:[%s4848_s5 + $0x20] sm:$0xff]  }
 0x130   :  { %2364 = vmatprep.subr.bf16.mxu0 %v3551_v14  ;;  %2404 = vmatpush2.bf16.msra.mxu1 %v3594_v25  ;;  %v3618_v14 = vld [vmem:[%s4848_s5 + $0x18] sm:$0xff]  }
 0x131   :  { %2405 = vmatprep.subr.bf16.mxu1 %v3599_v27 }
 0x133   :  { %2365 = vmatpush2.bf16.msra.mxu0 %v3549_v17  ;;  %v318_v17 = vsub.s32 2, %v4690_v23  ;;  %v3631_v23 = vld [vmem:[%s4850_s7 + $0x8] sm:$0xff]  }
 0x134   :  { %2366 = vmatprep.subr.bf16.mxu0 %v3554_v19  ;;  %2406 = vmatpush2.bf16.msra.mxu1 %v3597_v34 }
 0x135   :  { %2407 = vmatprep.subr.bf16.mxu1 %v3602_v37  ;;  %v319_v19 = vrot.slane %v4708_v29, %v318_v17 }
 0x137   :  { %2367 = vmatpush2.bf16.msra.mxu0 %v3552_v24 }
 0x138   :  { %2368 = vmatprep.subr.bf16.mxu0 %v3557_v26  ;;  %2408 = vmatpush2.bf16.msra.mxu1 %v3600_v38 }
 0x139   :  { %2409 = vmatprep.subr.bf16.mxu1 %v3605_v44  ;;  %v3622_v44 = vld [vmem:[%s4848_s5 + $0x8] sm:$0xff]  }
 0x13b   :  { %2369 = vmatpush2.bf16.msra.mxu0 %v3555_v49 }
 0x13c   :  { %2370 = vmatprep.subr.bf16.mxu0 %v3560_v8  ;;  %2410 = vmatpush2.bf16.msra.mxu1 %v3603_v32  ;;  %v3623_v32 = vld [vmem:[%s4848_s5 + $0x40] sm:$0xff]  }
 0x13d   :  { %2411 = vmatprep.subr.bf16.mxu1 %v3608_v54  ;;  %v3628_v54 = vld [vmem:[%s4850_s7 + $0x20] sm:$0xff]  }
 0x13f   :  { %2371 = vmatpush2.bf16.msra.mxu0 %v3558_v21 }
 0x140   :  { %2412 = vmatpush2.bf16.msra.mxu1 %v3606_v56  ;;  %3075 = vmatprep.subr.bf16.mxu0 %v3609_v3  ;;  %v2008_v56 = vld [vmem:[%s4847_s4] sm:$0x3] }
 0x142   :  { %v1724_v39 = vpop.f32.mrf.mxu0 }
 0x143   :  { %v1765_v41 = vpop.f32.mrf.mxu1  ;;  %v1725_v43 = vadd.f32 %v1724_v39, %v1684_v40 }
 0x144   :  { %v1726_v31 = vpop.f32.mrf.mxu0 }
 0x145   :  { %v1767_v52 = vpop.f32.mrf.mxu1  ;;  %v1766_v45 = vadd.f32 %v1765_v41, %v1725_v43  ;;  %v1727_v46 = vadd.f32 %v1726_v31, %v1686_v42 }
 0x146   :  { %v1728_v47 = vpop.f32.mrf.mxu0 }
 0x147   :  { %v1769_v48 = vpop.f32.mrf.mxu1  ;;  %v1768_v50 = vadd.f32 %v1767_v52, %v1727_v46  ;;  %v1936_v33 = vmax.f32 %v1766_v45, 0.0  ;;  %v3621_v52 = vld [vmem:[%s4848_s5 + $0x48] sm:$0xff]   ;;  %v3624_v47 = vld [vmem:[%s4848_s5] sm:$0xff]  }
 0x148   :  { %v1729_v51 = vpop.f32.mrf.mxu0 }
 0x149   :  { %v1770_v53 = vpop.f32.mrf.mxu1  ;;  %v1937_v55 = vmax.f32 %v1768_v50, 0.0  ;;  %v1940_v58 = vpack.c.bf16 %v1936_v33, %v1936_v33  ;;  %v3625_v50 = vld [vmem:[%s4850_s7 + $0x38] sm:$0xff]   ;;  %v3655_v33 = vmov 0.0   ;;  %v3626_v51 = vld [vmem:[%s4850_s7 + $0x30] sm:$0xff]  }
 0x14a   :  { %3106 = vmatprep.subr.bf16.mxu1 %v3655_v33  ;;  %v3627_v53 = vld [vmem:[%s4850_s7 + $0x28] sm:$0xff]  }
 0x14b   :  { %v1941_v57 = vpack.c.bf16 %v1937_v55, %v1937_v55  ;;  %v3629_v55 = vld [vmem:[%s4850_s7 + $0x18] sm:$0xff]  }
 0x14d   :  { %2372 = vmatprep.mubr.bf16.mxu0 %v1941_v57  ;;  %v2013_v57 = vrot.slane %v2008_v56, %v310_v28  ;;  %v3630_v28 = vld [vmem:[%s4850_s7 + $0x10] sm:$0xff]  }
 0x14e   :  { %2373 = vmatmul.mubr.bf16.vlgmr.msra.gmra.mxu0 %v1940_v58  ;;  %v2017_v58 = vrot.slane %v2008_v56, %v314_v30  ;;  %v3632_v30 = vld [vmem:[%s4850_s7] sm:$0xff]   ;;  %s3657_s7 = smov [#allocation2]  }
 0x14f   :  { %3076 = vmatpush3.bf16.msra.mxu0 %v3610_v4  ;;  %s2721_s14 = sshll.u32 %s3657_s7, 4  ;;  %s2722_s14 = int_to_ptr.vmem [resolvable:$true] %s2721_s14 }
 0x150   :  { %3077 = vmatprep.subr.bf16.mxu0 %v3611_v5  ;;  %p3638_p1 = scmp.lt.s32.totalorder %s2722_s14, %s2722_s14 }
 0x153   :  { %3078 = vmatpush3.bf16.msra.mxu0 %v3612_v6 }
 0x154   :  { %3079 = vmatprep.subr.bf16.mxu0 %v3613_v7 }
 0x157   :  { %3080 = vmatpush3.bf16.msra.mxu0 %v3614_v10  ;;  %v3049_v10 = vld [vmem:[%s4849_s6] ss:$0 sm:$0xff]  ;;  %s3633_s6 = scalar_lea.vmem %s2722_s14, 128 }
 0x158   :  { %3081 = vmatprep.subr.bf16.mxu0 %v3615_v11  ;;  %p3634_p0 = scmp.ne.s32.totalorder %s2722_s14, %s3633_s6  ;;  %p3639_p2 = scmp.lt.s32.totalorder %s3633_s6, %s3633_s6 }
 0x15a   :  { %p3640_p3 = por %p3639_p2, %p3638_p1 }
 0x15b   :  { %3082 = vmatpush3.bf16.msra.mxu0 %v3616_v12 }
 0x15c   :  { %3083 = vmatprep.subr.bf16.mxu0 %v3617_v13  ;;  %p3641_p4 = pnand %p3640_p3, %p3634_p0 }
 0x15f   :  { %3084 = vmatpush3.bf16.msra.mxu0 %v3618_v14 }
 0x160   :  { %3085 = vmatprep.subr.bf16.mxu0 %v3619_v15 }
 0x163   :  { %3086 = vmatpush3.bf16.msra.mxu0 %v3620_v16 }
 0x164   :  { %3087 = vmatprep.subr.bf16.mxu0 %v3621_v52 }
 0x167   :  { %3088 = vmatpush3.bf16.msra.mxu0 %v3622_v44 }
 0x168   :  { %3089 = vmatprep.subr.bf16.mxu0 %v3623_v32 }
 0x16b   :  { %3090 = vmatpush3.bf16.msra.mxu0 %v3624_v47 }
 0x182   :  { %v1806_v59 = vpop.f32.mrf.mxu0 }
 0x183   :  { %v1847_v60 = vpop.f32.mrf.mxu1  ;;  %v1807_v24 = vadd.f32 %v1806_v59, %v319_v19 }
 0x184   :  { %v1808_v61 = vpop.f32.mrf.mxu0 }
 0x185   :  { %v1849_v62 = vpop.f32.mrf.mxu1  ;;  %v1809_v25 = vadd.f32 %v1808_v61, %v323_v22  ;;  %v1848_v26 = vadd.f32 %v1847_v60, %v1807_v24 }
 0x186   :  { %v1810_v63 = vpop.f32.mrf.mxu0 }
 0x187   :  { %v1851_v0 = vpop.f32.mrf.mxu1  ;;  %v1850_v34 = vadd.f32 %v1849_v62, %v1809_v25 }
 0x188   :  { %v1811_v1 = vpop.f32.mrf.mxu0 }
 0x189   :  { %v1852_v2 = vpop.f32.mrf.mxu1 }
 0x1c2   :  { %v1888_v27 = vpop.f32.mrf.mxu0 }
 0x1c3   :  { %v1929_v49 = vpop.f32.mrf.mxu1  ;;  %v1889_v8 = vadd.f32 %v1888_v27, %v1848_v26 }
 0x1c4   :  { %v1890_v9 = vpop.f32.mrf.mxu0 }
 0x1c5   :  { %v1931_v20 = vpop.f32.mrf.mxu1  ;;  %v1930_v21 = vadd.f32 %v1929_v49, %v1889_v8  ;;  %v1891_v35 = vadd.f32 %v1890_v9, %v1850_v34 }
 0x1c6   :  { %v1892_v36 = vpop.f32.mrf.mxu0 }
 0x1c7   :  { %v1933_v37 = vpop.f32.mrf.mxu1  ;;  %v1932_v40 = vadd.f32 %v1931_v20, %v1891_v35  ;;  %v1938_v38 = vmax.f32 %v1930_v21, 0.0 }
 0x1c8   :  { %v1893_v39 = vpop.f32.mrf.mxu0 }
 0x1c9   :  { %v1934_v41 = vpop.f32.mrf.mxu1  ;;  %v1939_v42 = vmax.f32 %v1932_v40, 0.0  ;;  %v1942_v29 = vpack.c.bf16 %v1938_v38, %v1938_v38 }
 0x1cb   :  { %v1943_v43 = vpack.c.bf16 %v1939_v42, %v1939_v42 }
 0x1cd   :  { %2413 = vmatprep.mubr.bf16.mxu1 %v1943_v43 }
 0x1ce   :  { %2414 = vmatmul.mubr.bf16.vlgmr.msra.gmra.mxu1 %v1942_v29 }
 0x1cf   :  { %3107 = vmatpush3.bf16.msra.mxu1 %v3625_v50  ;;  %3122 = vmatprep.mubr.msk.bf16.mxu1 %vm3656_vm0, %v3655_v33 }
 0x1d0   :  { %3108 = vmatprep.subr.bf16.mxu1 %v3655_v33 }
 0x1d3   :  { %3109 = vmatpush3.bf16.msra.mxu1 %v3626_v51 }
 0x1d4   :  { %3110 = vmatprep.subr.bf16.mxu1 %v3655_v33 }
 0x1d7   :  { %3111 = vmatpush3.bf16.msra.mxu1 %v3627_v53 }
 0x1d8   :  { %3112 = vmatprep.subr.bf16.mxu1 %v3655_v33 }
 0x1db   :  { %3113 = vmatpush3.bf16.msra.mxu1 %v3628_v54 }
 0x1dc   :  { %3114 = vmatprep.subr.bf16.mxu1 %v3655_v33 }
 0x1df   :  { %3115 = vmatpush3.bf16.msra.mxu1 %v3629_v55 }
 0x1e0   :  { %3116 = vmatprep.subr.bf16.mxu1 %v3655_v33 }
 0x1e3   :  { %3117 = vmatpush3.bf16.msra.mxu1 %v3630_v28 }
 0x1e4   :  { %3118 = vmatprep.subr.bf16.mxu1 %v3655_v33 }
 0x1e7   :  { %3119 = vmatpush3.bf16.msra.mxu1 %v3631_v23 }
 0x1e8   :  { %3120 = vmatprep.subr.bf16.mxu1 %v3655_v33 }
 0x1eb   :  { %3121 = vmatpush3.bf16.msra.mxu1 %v3632_v30 }
 0x20e   :  { %v2374_v31 = vpop.f32.mrf.mxu0 }
 0x20f   :  { %v2375_v59 = vadd.f32 %v2374_v31, %v2013_v57 }
 0x210   :  { %v2376_v45 = vpop.f32.mrf.mxu0 }
 0x211   :  { %v2377_v61 = vadd.f32 %v2376_v45, %v2017_v58 }
 0x212   :  { %v2378_v46 = vpop.f32.mrf.mxu0 }
 0x214   :  { %v2379_v48 = vpop.f32.mrf.mxu0 }
 0x28e   :  { %v2415_v60 = vpop.f32.mrf.mxu1 }
 0x28f   :  { %v2416_v62 = vadd.f32 %v2415_v60, %v2375_v59 }
 0x290   :  { %v2417_v63 = vpop.f32.mrf.mxu1 }
 0x291   :  { %v2418_v0 = vadd.f32 %v2417_v63, %v2377_v61  ;;  %v2422_v1 = vmax.f32 %v2416_v62, 0.0 }
 0x292   :  { %v2419_v2 = vpop.f32.mrf.mxu1 }
 0x293   :  { %v2423_v3 = vmax.f32 %v2418_v0, 0.0  ;;  %v2424_v6 = vpack.c.bf16 %v2422_v1, %v2422_v1 }
 0x294   :  { %v2420_v4 = vpop.f32.mrf.mxu1 }
 0x295   :  { %v2425_v5 = vpack.c.bf16 %v2423_v3, %v2423_v3 }
 0x297   :  { %2593 = vmatprep.mubr.bf16.mxu0 %v2425_v5 }
 0x298   :  { %2594 = vmatmul.mubr.bf16.vlgmr.msra.gmra.mxu0 %v2424_v6 }
 0x358   :  { %v3091_v7 = vpop.f32.mrf.mxu0 }
 0x35a   :  { %v3092_v11 = vpop.f32.mrf.mxu0 }
 0x35b   :  { %v3093_v12 = vadd.f32 %v3092_v11, %v3091_v7 }
 0x35c   :  { %v3094_v13 = vpop.f32.mrf.mxu0 }
 0x35d   :  { %v2596_v14 = vadd.f32 %v3093_v12, %v3049_v10 }
 0x35e   :  { %v3095_v15 = vpop.f32.mrf.mxu0 }
 0x35f   :  { %v2601_v16 = vmax.f32 %v2596_v14, 0.0 }
 0x361   :  { %v2602_v17 = vpack.c.bf16 %v2601_v16, %v2601_v16 }
 0x363   :  { %3123 = vmatmul.mubr.bf16.vlgmr.msra.gmra.mxu1 %v2602_v17 }
 0x423   :  { %v2708_v19 = vpop.f32.mrf.mxu1 }
 0x424   :  { %v2709_v22 = vadd.f32 %v3066_v18, %v2708_v19 }
 0x425   :  { %v3124_v24 = vpop.f32.mrf.mxu1 }
 0x426   :  { %2714 = vst [vmem:[#allocation2] sm:$0xff] %v2709_v22 }
 0x427   :  { %v2711_v25 = vpop.f32.mrf.mxu1 }
 0x428   :  { %3644 = shalt.err (!%p3641_p4)
}
 0x429   :  { %2724 = dma.vmem_to_hbm [thread:$0]  %s2722_s14, 128, %s4852_s9, [#allocation3]   ;;  %v3125_v26 = vpop.f32.mrf.mxu1 }
 0x42a   :  { %3653 = dma.done.wait [#allocation3], 128  }
 0x42b   :  { %3654 = vsyncadd [#allocation3], 4294967168 }
 0x42c   :  { %2728 = vsyncpa [#allocation3], 1 }

</bundles_post_ra>
